<compile_context>
chip_gen: v6e
topology: v6e:2x2x1
jax: 0.10.0
libtpu: 0.0.40
codegen_flags: <defaults>
</compile_context>

<pallas_src>
import jax
import jax.numpy as jnp
import numpy as np
from jax import lax
from jax.experimental import pallas as pl
from jax.experimental.pallas import tpu as pltpu


# ------------------------------- helpers ------------------------------------

def _round_up(x, m):
    return (x + m - 1) // m * m


def _pick_tm(M, tm_max=256):
    """M-tile: multiple of 8, <= tm_max, prefer >=2 grid steps (v7x 2 TCs)."""
    tm = min(tm_max, _round_up(M, 8))
    if pl.cdiv(M, tm) < 2 and M > 8:
        tm = _round_up(pl.cdiv(M, 2), 8)
    return tm


def _pick_tn(Cpad, pref=256):
    """C-tile: 256 for the 256x256 MXU (v6e/v7x) when it divides Cpad."""
    tn = min(pref, Cpad)
    if Cpad % tn != 0:
        tn = 128
    return tn


def _vmem_limit(*block_bytes):
    """Double-buffered blocks + headroom; floor at the 32MiB scoped default."""
    need = sum(2 * b for b in block_bytes) + (8 << 20)
    return int(min(max(need, 32 << 20), 96 << 20))


# ------------------------- Pallas kernel 1: conv1 ----------------------------
# relu(bn1(conv3x3_s2(x))) as a tiled matmul on im2col patches.

def _matmul_bn_relu_kernel(p_ref, w_ref, s_ref, b_ref, o_ref):
    acc = jnp.dot(p_ref[...], w_ref[...], preferred_element_type=jnp.float32)
    y = jnp.maximum(acc * s_ref[...] + b_ref[...], 0.0)
    o_ref[...] = y.astype(o_ref.dtype)


def matmul_bn_relu(p, w, scale, bias, *, out_dtype=jnp.bfloat16, tm=256, tn=256):
    """p:(M,K) bf16, w:(K,C) bf16, scale/bias:(1,C) f32 -> relu(bn(p@w)):(M,C)."""
    M, K = p.shape
    _, C = w.shape
    tm = _pick_tm(M, tm)
    tn = _pick_tn(C, tn)
    Mp = _round_up(M, tm)
    if Mp != M:
        p = jnp.pad(p, ((0, Mp - M), (0, 0)))

    blk_bytes = (tm * K * 2, K * tn * 2, 2 * tn * 4,
                 tm * tn * np.dtype(out_dtype).itemsize)
    out = pl.pallas_call(
        _matmul_bn_relu_kernel,
        out_shape=jax.ShapeDtypeStruct((Mp, C), out_dtype),
        grid=(Mp // tm, C // tn),
        in_specs=[
            pl.BlockSpec((tm, K), lambda i, c: (i, 0)),
            pl.BlockSpec((K, tn), lambda i, c: (0, c)),
            pl.BlockSpec((1, tn), lambda i, c: (0, c)),
            pl.BlockSpec((1, tn), lambda i, c: (0, c)),
        ],
        out_specs=pl.BlockSpec((tm, tn), lambda i, c: (i, c)),
        compiler_params=pltpu.CompilerParams(
            dimension_semantics=("parallel", "parallel"),
            vmem_limit_bytes=_vmem_limit(*blk_bytes)),
    )(p, w, scale, bias)
    return out[:M] if Mp != M else out


# ------------- Pallas kernel 2: conv2 + bn2 + shortcut + add + relu ----------
# In-kernel 3x3 patch extraction (9 shifted sub-matmuls) + fused 1x1 shortcut.

def _conv2_residual_kernel(x1_ref, w2_ref, sc_ref, wsc_ref,
                           s2_ref, b2_ref, ssc_ref, bsc_ref, o_ref):
    _, Ho, Wo, tn = o_ref.shape
    x1 = x1_ref[...]                       # (1, Ho+2, Wo+2, Cp)   bf16
    w2 = w2_ref[...]                       # (3, 3, Cp, tn)        bf16
    sc = sc_ref[...]                       # (1, Ho, Wo, Cin_p)    bf16
    cin = sc.shape[-1]

    # shortcut: 1x1 stride-2 conv (subsample done by the wrapper) + bn_sc
    acc = jnp.dot(sc.reshape(Ho * Wo, cin), wsc_ref[...],
                  preferred_element_type=jnp.float32)
    acc = acc * ssc_ref[...] + bsc_ref[...]

    # conv2: 3x3 stride 1 as 9 shifted sub-matmuls accumulated in f32
    main = jnp.zeros((Ho * Wo, tn), jnp.float32)
    for kh in range(3):
        for kw in range(3):
            patch = x1[0, kh:kh + Ho, kw:kw + Wo, :].reshape(Ho * Wo, -1)
            main = main + jnp.dot(patch, w2[kh, kw],
                                  preferred_element_type=jnp.float32)
    main = main * s2_ref[...] + b2_ref[...]

    o_ref[...] = jnp.maximum(main + acc, 0.0).reshape(1, Ho, Wo, tn)


def conv2_residual_bn_relu(x1_pad, w2, sc, wsc, s2, b2, ssc, bsc, *, tn=256):
    """x1_pad:(N,Ho+2,Wo+2,Cp) bf16, w2:(3,3,Cp,C) bf16, sc:(N,Ho,Wo,Cin_p) bf16,
    wsc:(Cin_p,C) bf16, scales/biases:(1,C) f32 -> (N,Ho,Wo,C) f32."""
    N, Hp, Wp, Cp = x1_pad.shape
    Ho, Wo = Hp - 2, Wp - 2
    Cin = sc.shape[-1]
    C = w2.shape[-1]
    tn = _pick_tn(C, tn)

    blk_bytes = (Hp * Wp * Cp * 2, 9 * Cp * tn * 2, Ho * Wo * Cin * 2,
                 Cin * tn * 2, 4 * tn * 4, Ho * Wo * tn * 4)
    return pl.pallas_call(
        _conv2_residual_kernel,
        out_shape=jax.ShapeDtypeStruct((N, Ho, Wo, C), jnp.float32),
        grid=(N, C // tn),
        in_specs=[
            pl.BlockSpec((1, Hp, Wp, Cp), lambda n, c: (n, 0, 0, 0)),
            pl.BlockSpec((3, 3, Cp, tn), lambda n, c: (0, 0, 0, c)),
            pl.BlockSpec((1, Ho, Wo, Cin), lambda n, c: (n, 0, 0, 0)),
            pl.BlockSpec((Cin, tn), lambda n, c: (0, c)),
            pl.BlockSpec((1, tn), lambda n, c: (0, c)),
            pl.BlockSpec((1, tn), lambda n, c: (0, c)),
            pl.BlockSpec((1, tn), lambda n, c: (0, c)),
            pl.BlockSpec((1, tn), lambda n, c: (0, c)),
        ],
        out_specs=pl.BlockSpec((1, Ho, Wo, tn), lambda n, c: (n, 0, 0, c)),
        compiler_params=pltpu.CompilerParams(
            dimension_semantics=("parallel", "parallel"),
            vmem_limit_bytes=_vmem_limit(*blk_bytes)),
    )(x1_pad, w2, sc, wsc, s2, b2, ssc, bsc)


# ------------------------------ JAX glue -------------------------------------

def _im2col_3x3_s2(x_nhwc):
    """3x3 patches, stride 2, padding 1. (N,H,W,C) -> (N*Ho*Wo, 9*C)."""
    N, H, W, C = x_nhwc.shape
    Ho = (H - 1) // 2 + 1
    Wo = (W - 1) // 2 + 1
    xp = jnp.pad(x_nhwc, ((0, 0), (1, 1), (1, 1), (0, 0)))
    cols = []
    for kh in range(3):
        for kw in range(3):
            cols.append(xp[:, kh:kh + 2 * (Ho - 1) + 1:2,
                              kw:kw + 2 * (Wo - 1) + 1:2, :])
    p = jnp.concatenate(cols, axis=-1)               # (N, Ho, Wo, 9*C)
    return p.reshape(N * Ho * Wo, 9 * C), (Ho, Wo)


def fold_bn(gamma, beta, mean, var, cpad, eps=1e-5):
    scale = gamma / jnp.sqrt(var + eps)
    bias = beta - mean * scale
    scale = jnp.pad(scale, (0, cpad - scale.shape[0]))   # padded chans -> 0
    bias = jnp.pad(bias, (0, cpad - bias.shape[0]))
    return (scale.reshape(1, -1).astype(jnp.float32),
            bias.reshape(1, -1).astype(jnp.float32))


def block_b_forward(x_nchw, params):
    """BlockB forward. Input/output in NCHW to match the PyTorch module."""
    x = jnp.transpose(x_nchw, (0, 2, 3, 1)).astype(jnp.float32)   # NHWC
    N, H, W, Cin = x.shape
    Cout = params["w1"].shape[-1]

    Cin_p = _round_up(Cin, 128)
    Cout_p = _round_up(Cout, 128)
    K1 = 9 * Cin
    K1_p = _round_up(K1, 128)

    # --- conv1 (3x3, stride 2, pad 1) + bn1 + relu : bf16 Pallas matmul ---
    p1, (Ho, Wo) = _im2col_3x3_s2(x)
    p1 = jnp.pad(p1, ((0, 0), (0, K1_p - K1))).astype(jnp.bfloat16)
    w1 = params["w1"].reshape(K1, Cout)                   # (kh,kw,cin) order
    w1 = jnp.pad(w1, ((0, K1_p - K1), (0, Cout_p - Cout))).astype(jnp.bfloat16)
    s1, b1 = fold_bn(params["g1"], params["b1"], params["m1"], params["v1"], Cout_p)
    out1 = matmul_bn_relu(p1, w1, s1, b1)                 # (N*Ho*Wo, Cout_p) bf16

    # spatial halo pad for conv2's in-kernel patch extraction
    out1 = out1.reshape(N, Ho, Wo, Cout_p)
    out1 = jnp.pad(out1, ((0, 0), (1, 1), (1, 1), (0, 0)))

    # --- conv2 + bn2 fused with shortcut (conv1x1 s2) + bn_sc + add + relu ---
    w2 = jnp.pad(params["w2"],
                 ((0, 0), (0, 0), (0, Cout_p - Cout), (0, Cout_p - Cout))
                 ).astype(jnp.bfloat16)
    s2, b2 = fold_bn(params["g2"], params["b2"], params["m2"], params["v2"], Cout_p)

    sc = jnp.pad(x[:, ::2, ::2, :],
                 ((0, 0), (0, 0), (0, 0), (0, Cin_p - Cin))).astype(jnp.bfloat16)
    wsc = jnp.pad(params["wsc"],
                  ((0, Cin_p - Cin), (0, Cout_p - Cout))).astype(jnp.bfloat16)
    ssc, bsc = fold_bn(params["gsc"], params["bsc"], params["msc"], params["vsc"], Cout_p)

    out = conv2_residual_bn_relu(out1, w2, sc, wsc, s2, b2, ssc, bsc)
    out = out[..., :Cout]
    return jnp.transpose(out, (0, 3, 1, 2))               # back to NCHW


# --------------------------- pure-JAX reference -------------------------------

def block_b_reference(x_nchw, params, eps=1e-5, quantize_bf16=False):
    """Reference using lax.conv. With quantize_bf16=True, operands are rounded
    to bf16 exactly like the kernel path (fp32 accumulation), so the comparison
    isolates kernel correctness from the intended bf16 approximation."""
    if quantize_bf16:
        q = lambda a: a.astype(jnp.bfloat16).astype(jnp.float32)
    else:
        q = lambda a: a
    x = jnp.transpose(x_nchw, (0, 2, 3, 1)).astype(jnp.float32)
    dn = ("NHWC", "HWIO", "NHWC")

    def bn(y, g, b, m, v):
        return (y - m) / jnp.sqrt(v + eps) * g + b

    out = lax.conv_general_dilated(q(x), q(params["w1"]), (2, 2),
                                   ((1, 1), (1, 1)), dimension_numbers=dn,
                                   preferred_element_type=jnp.float32)
    out = jnp.maximum(bn(out, params["g1"], params["b1"],
                         params["m1"], params["v1"]), 0.0)
    out = lax.conv_general_dilated(q(out), q(params["w2"]), (1, 1),
                                   ((1, 1), (1, 1)), dimension_numbers=dn,
                                   preferred_element_type=jnp.float32)
    out = bn(out, params["g2"], params["b2"], params["m2"], params["v2"])
    wsc = params["wsc"].reshape(1, 1, *params["wsc"].shape)
    sc = lax.conv_general_dilated(q(x), q(wsc), (2, 2), ((0, 0), (0, 0)),
                                  dimension_numbers=dn,
                                  preferred_element_type=jnp.float32)
    sc = bn(sc, params["gsc"], params["bsc"], params["msc"], params["vsc"])
    out = jnp.maximum(out + sc, 0.0)
    return jnp.transpose(out, (0, 3, 1, 2))


# ---------------------------------- main --------------------------------------

def make_params(key, in_planes, out_planes):
    ks = jax.random.split(key, 16)
    f = jnp.float32

    def bn_params(k0, k1, k2, k3, c):
        return (0.5 + jax.random.uniform(k0, (c,), dtype=f),        # gamma
                0.1 * jax.random.normal(k1, (c,), dtype=f),         # beta
                0.1 * jax.random.normal(k2, (c,), dtype=f),         # running_mean
                0.5 + jax.random.uniform(k3, (c,), dtype=f))        # running_var

    params = {}
    # conv weights stored HWIO (PyTorch OIHW -> transpose(2,3,1,0) equivalent)
    params["w1"] = 0.1 * jax.random.normal(ks[0], (3, 3, in_planes, out_planes), dtype=f)
    params["w2"] = 0.1 * jax.random.normal(ks[1], (3, 3, out_planes, out_planes), dtype=f)
    params["wsc"] = 0.1 * jax.random.normal(ks[2], (in_planes, out_planes), dtype=f)
    params["g1"], params["b1"], params["m1"], params["v1"] = bn_params(*ks[3:7], out_planes)
    params["g2"], params["b2"], params["m2"], params["v2"] = bn_params(*ks[7:11], out_planes)
    params["gsc"], params["bsc"], params["msc"], params["vsc"] = bn_params(*ks[11:15], out_planes)
    return params


if __name__ == "__main__":
    key = jax.random.PRNGKey(0)
    k_x, k_p = jax.random.split(key)

    N, Cin, Cout, H, W = 2, 4, 8, 16, 16
    x = jax.random.normal(k_x, (N, Cin, H, W), dtype=jnp.float32)   # NCHW input
    params = make_params(k_p, Cin, Cout)

    fwd = jax.jit(block_b_forward)
    out = jax.block_until_ready(fwd(x, params))

    # tight check vs. reference on the same bf16-operand / fp32-accum path
    ref_bf16 = jax.block_until_ready(block_b_reference(x, params, quantize_bf16=True))
    # loose sanity check vs. the pure-fp32 PyTorch-equivalent math
    ref_f32 = jax.block_until_ready(block_b_reference(x, params, quantize_bf16=False))

    assert out.shape == (N, Cout, H // 2, W // 2), out.shape
    assert np.allclose(np.asarray(out), np.asarray(ref_bf16), atol=5e-3, rtol=5e-3)
    assert np.allclose(np.asarray(out), np.asarray(ref_f32), atol=1.5e-1, rtol=1.5e-1)
    print("KERNEL_OK")
</pallas_src>

<mosaic_0001>
module attributes {stable_mosaic.version = 11 : i64} {
  func.func @_matmul_bn_relu_kernel(%arg0: i32, %arg1: i32, %arg2: memref<64x128xbf16, #tpu.memory_space<vmem>>, %arg3: memref<128x128xbf16, #tpu.memory_space<vmem>>, %arg4: memref<1x128xf32, #tpu.memory_space<vmem>>, %arg5: memref<1x128xf32, #tpu.memory_space<vmem>>, %arg6: memref<64x128xbf16, #tpu.memory_space<vmem>>) attributes {dimension_semantics = [#tpu.dimension_semantics<parallel>, #tpu.dimension_semantics<parallel>], iteration_bounds = array<i64: 2, 1>, scalar_prefetch = 0 : i64, scratch_operands = 0 : i64, tpu.core_type = #tpu.core_type<tc>, window_params = [{transform_indices = @transform_0, window_bounds = array<i64: 64, 128>}, {transform_indices = @transform_1, window_bounds = array<i64: 128, 128>}, {transform_indices = @transform_2, window_bounds = array<i64: 1, 128>}, {transform_indices = @transform_3, window_bounds = array<i64: 1, 128>}, {transform_indices = @transform_4, window_bounds = array<i64: 64, 128>}]} {
    %c0 = arith.constant 0 : index
    %c0_0 = arith.constant 0 : index
    %0 = vector.load %arg2[%c0, %c0_0] : memref<64x128xbf16, #tpu.memory_space<vmem>>, vector<64x128xbf16>
    %c0_1 = arith.constant 0 : index
    %c0_2 = arith.constant 0 : index
    %1 = vector.load %arg3[%c0_1, %c0_2] : memref<128x128xbf16, #tpu.memory_space<vmem>>, vector<128x128xbf16>
    %cst = arith.constant dense<0.000000e+00> : vector<64x128xf32>
    %2 = tpu.matmul %0, %1, %cst {dimension_numbers = #tpu.dot_dimension_numbers<[1], [0], [0], [1], [0, 0, 1, 1], [], []>} : vector<64x128xbf16>, vector<128x128xbf16>, vector<64x128xf32> -> vector<64x128xf32>
    %c0_3 = arith.constant 0 : index
    %c0_4 = arith.constant 0 : index
    %3 = vector.load %arg4[%c0_3, %c0_4] : memref<1x128xf32, #tpu.memory_space<vmem>>, vector<1x128xf32>
    %4 = vector.broadcast %3 : vector<1x128xf32> to vector<64x128xf32>
    %5 = arith.mulf %2, %4 : vector<64x128xf32>
    %c0_5 = arith.constant 0 : index
    %c0_6 = arith.constant 0 : index
    %6 = vector.load %arg5[%c0_5, %c0_6] : memref<1x128xf32, #tpu.memory_space<vmem>>, vector<1x128xf32>
    %7 = vector.broadcast %6 : vector<1x128xf32> to vector<64x128xf32>
    %8 = arith.addf %5, %7 : vector<64x128xf32>
    %cst_7 = arith.constant 0.000000e+00 : f32
    %9 = vector.broadcast %cst_7 : f32 to vector<64x128xf32>
    %10 = arith.maximumf %8, %9 : vector<64x128xf32>
    %11 = arith.truncf %10 : vector<64x128xf32> to vector<64x128xbf16>
    %c0_8 = arith.constant 0 : index
    %c0_9 = arith.constant 0 : index
    %12 = vector.load %arg6[%c0_8, %c0_9] : memref<64x128xbf16, #tpu.memory_space<vmem>>, vector<64x128xbf16>
    tpu.vector_store %arg6[%c0_8, %c0_9], %11 {strides = array<i32>} : memref<64x128xbf16, #tpu.memory_space<vmem>>, vector<64x128xbf16>,
    return
  }
  func.func @transform_0(%arg0: i32, %arg1: i32) -> (i32, i32) {
    %c0_i32 = arith.constant 0 : i32
    %c0_i32_0 = arith.constant 0 : i32
    return %arg0, %c0_i32 : i32, i32
  }
  func.func @transform_1(%arg0: i32, %arg1: i32) -> (i32, i32) {
    %c0_i32 = arith.constant 0 : i32
    %c0_i32_0 = arith.constant 0 : i32
    return %c0_i32, %arg1 : i32, i32
  }
  func.func @transform_2(%arg0: i32, %arg1: i32) -> (i32, i32) {
    %c0_i32 = arith.constant 0 : i32
    %c0_i32_0 = arith.constant 0 : i32
    return %c0_i32, %arg1 : i32, i32
  }
  func.func @transform_3(%arg0: i32, %arg1: i32) -> (i32, i32) {
    %c0_i32 = arith.constant 0 : i32
    %c0_i32_0 = arith.constant 0 : i32
    return %c0_i32, %arg1 : i32, i32
  }
  func.func @transform_4(%arg0: i32, %arg1: i32) -> (i32, i32) {
    %c0_i32 = arith.constant 0 : i32
    return %arg0, %arg1 : i32, i32
  }
}

module attributes {stable_mosaic.version = 11 : i64} {
  func.func @_conv2_residual_kernel(%arg0: i32, %arg1: i32, %arg2: memref<1x10x10x128xbf16, #tpu.memory_space<vmem>>, %arg3: memref<3x3x128x128xbf16, #tpu.memory_space<vmem>>, %arg4: memref<1x8x8x128xbf16, #tpu.memory_space<vmem>>, %arg5: memref<128x128xbf16, #tpu.memory_space<vmem>>, %arg6: memref<1x128xf32, #tpu.memory_space<vmem>>, %arg7: memref<1x128xf32, #tpu.memory_space<vmem>>, %arg8: memref<1x128xf32, #tpu.memory_space<vmem>>, %arg9: memref<1x128xf32, #tpu.memory_space<vmem>>, %arg10: memref<1x8x8x128xf32, #tpu.memory_space<vmem>>) attributes {dimension_semantics = [#tpu.dimension_semantics<parallel>, #tpu.dimension_semantics<parallel>], iteration_bounds = array<i64: 2, 1>, scalar_prefetch = 0 : i64, scratch_operands = 0 : i64, tpu.core_type = #tpu.core_type<tc>, window_params = [{transform_indices = @transform_0, window_bounds = array<i64: 1, 10, 10, 128>}, {transform_indices = @transform_1, window_bounds = array<i64: 3, 3, 128, 128>}, {transform_indices = @transform_2, window_bounds = array<i64: 1, 8, 8, 128>}, {transform_indices = @transform_3, window_bounds = array<i64: 128, 128>}, {transform_indices = @transform_4, window_bounds = array<i64: 1, 128>}, {transform_indices = @transform_5, window_bounds = array<i64: 1, 128>}, {transform_indices = @transform_6, window_bounds = array<i64: 1, 128>}, {transform_indices = @transform_7, window_bounds = array<i64: 1, 128>}, {transform_indices = @transform_8, window_bounds = array<i64: 1, 8, 8, 128>}]} {
    %c0 = arith.constant 0 : index
    %c0_0 = arith.constant 0 : index
    %c0_1 = arith.constant 0 : index
    %c0_2 = arith.constant 0 : index
    %0 = vector.load %arg2[%c0, %c0_0, %c0_1, %c0_2] : memref<1x10x10x128xbf16, #tpu.memory_space<vmem>>, vector<1x10x10x128xbf16>
    %c0_3 = arith.constant 0 : index
    %c0_4 = arith.constant 0 : index
    %c0_5 = arith.constant 0 : index
    %c0_6 = arith.constant 0 : index
    %1 = vector.load %arg3[%c0_3, %c0_4, %c0_5, %c0_6] : memref<3x3x128x128xbf16, #tpu.memory_space<vmem>>, vector<3x3x128x128xbf16>
    %c0_7 = arith.constant 0 : index
    %c0_8 = arith.constant 0 : index
    %c0_9 = arith.constant 0 : index
    %c0_10 = arith.constant 0 : index
    %2 = vector.load %arg4[%c0_7, %c0_8, %c0_9, %c0_10] : memref<1x8x8x128xbf16, #tpu.memory_space<vmem>>, vector<1x8x8x128xbf16>
    %3 = vector.shape_cast %2 : vector<1x8x8x128xbf16> to vector<64x128xbf16>
    %c0_11 = arith.constant 0 : index
    %c0_12 = arith.constant 0 : index
    %4 = vector.load %arg5[%c0_11, %c0_12] : memref<128x128xbf16, #tpu.memory_space<vmem>>, vector<128x128xbf16>
    %cst = arith.constant dense<0.000000e+00> : vector<64x128xf32>
    %5 = tpu.matmul %3, %4, %cst {dimension_numbers = #tpu.dot_dimension_numbers<[1], [0], [0], [1], [0, 0, 1, 1], [], []>} : vector<64x128xbf16>, vector<128x128xbf16>, vector<64x128xf32> -> vector<64x128xf32>
    %c0_13 = arith.constant 0 : index
    %c0_14 = arith.constant 0 : index
    %6 = vector.load %arg8[%c0_13, %c0_14] : memref<1x128xf32, #tpu.memory_space<vmem>>, vector<1x128xf32>
    %7 = vector.broadcast %6 : vector<1x128xf32> to vector<64x128xf32>
    %8 = arith.mulf %5, %7 : vector<64x128xf32>
    %c0_15 = arith.constant 0 : index
    %c0_16 = arith.constant 0 : index
    %9 = vector.load %arg9[%c0_15, %c0_16] : memref<1x128xf32, #tpu.memory_space<vmem>>, vector<1x128xf32>
    %10 = vector.broadcast %9 : vector<1x128xf32> to vector<64x128xf32>
    %11 = arith.addf %8, %10 : vector<64x128xf32>
    %cst_17 = arith.constant 0.000000e+00 : f32
    %12 = vector.broadcast %cst_17 : f32 to vector<64x128xf32>
    %13 = vector.extract_strided_slice %0 {offsets = [0, 0, 0, 0], sizes = [1, 8, 8, 128], strides = [1, 1, 1, 1]} : vector<1x10x10x128xbf16> to vector<1x8x8x128xbf16>
    %14 = vector.shape_cast %13 : vector<1x8x8x128xbf16> to vector<8x8x128xbf16>
    %15 = vector.shape_cast %14 : vector<8x8x128xbf16> to vector<64x128xbf16>
    %16 = vector.extract_strided_slice %1 {offsets = [0, 0, 0, 0], sizes = [1, 1, 128, 128], strides = [1, 1, 1, 1]} : vector<3x3x128x128xbf16> to vector<1x1x128x128xbf16>
    %17 = vector.shape_cast %16 : vector<1x1x128x128xbf16> to vector<128x128xbf16>
    %cst_18 = arith.constant dense<0.000000e+00> : vector<64x128xf32>
    %18 = tpu.matmul %15, %17, %cst_18 {dimension_numbers = #tpu.dot_dimension_numbers<[1], [0], [0], [1], [0, 0, 1, 1], [], []>} : vector<64x128xbf16>, vector<128x128xbf16>, vector<64x128xf32> -> vector<64x128xf32>
    %19 = arith.addf %12, %18 : vector<64x128xf32>
    %20 = vector.extract_strided_slice %0 {offsets = [0, 0, 1, 0], sizes = [1, 8, 8, 128], strides = [1, 1, 1, 1]} : vector<1x10x10x128xbf16> to vector<1x8x8x128xbf16>
    %21 = vector.shape_cast %20 : vector<1x8x8x128xbf16> to vector<8x8x128xbf16>
    %22 = vector.shape_cast %21 : vector<8x8x128xbf16> to vector<64x128xbf16>
    %23 = vector.extract_strided_slice %1 {offsets = [0, 1, 0, 0], sizes = [1, 1, 128, 128], strides = [1, 1, 1, 1]} : vector<3x3x128x128xbf16> to vector<1x1x128x128xbf16>
    %24 = vector.shape_cast %23 : vector<1x1x128x128xbf16> to vector<128x128xbf16>
    %cst_19 = arith.constant dense<0.000000e+00> : vector<64x128xf32>
    %25 = tpu.matmul %22, %24, %cst_19 {dimension_numbers = #tpu.dot_dimension_numbers<[1], [0], [0], [1], [0, 0, 1, 1], [], []>} : vector<64x128xbf16>, vector<128x128xbf16>, vector<64x128xf32> -> vector<64x128xf32>
    %26 = arith.addf %19, %25 : vector<64x128xf32>
    %27 = vector.extract_strided_slice %0 {offsets = [0, 0, 2, 0], sizes = [1, 8, 8, 128], strides = [1, 1, 1, 1]} : vector<1x10x10x128xbf16> to vector<1x8x8x128xbf16>
    %28 = vector.shape_cast %27 : vector<1x8x8x128xbf16> to vector<8x8x128xbf16>
    %29 = vector.shape_cast %28 : vector<8x8x128xbf16> to vector<64x128xbf16>
    %30 = vector.extract_strided_slice %1 {offsets = [0, 2, 0, 0], sizes = [1, 1, 128, 128], strides = [1, 1, 1, 1]} : vector<3x3x128x128xbf16> to vector<1x1x128x128xbf16>
    %31 = vector.shape_cast %30 : vector<1x1x128x128xbf16> to vector<128x128xbf16>
    %cst_20 = arith.constant dense<0.000000e+00> : vector<64x128xf32>
    %32 = tpu.matmul %29, %31, %cst_20 {dimension_numbers = #tpu.dot_dimension_numbers<[1], [0], [0], [1], [0, 0, 1, 1], [], []>} : vector<64x128xbf16>, vector<128x128xbf16>, vector<64x128xf32> -> vector<64x128xf32>
    %33 = arith.addf %26, %32 : vector<64x128xf32>
    %34 = vector.extract_strided_slice %0 {offsets = [0, 1, 0, 0], sizes = [1, 8, 8, 128], strides = [1, 1, 1, 1]} : vector<1x10x10x128xbf16> to vector<1x8x8x128xbf16>
    %35 = vector.shape_cast %34 : vector<1x8x8x128xbf16> to vector<8x8x128xbf16>
    %36 = vector.shape_cast %35 : vector<8x8x128xbf16> to vector<64x128xbf16>
    %37 = vector.extract_strided_slice %1 {offsets = [1, 0, 0, 0], sizes = [1, 1, 128, 128], strides = [1, 1, 1, 1]} : vector<3x3x128x128xbf16> to vector<1x1x128x128xbf16>
    %38 = vector.shape_cast %37 : vector<1x1x128x128xbf16> to vector<128x128xbf16>
    %cst_21 = arith.constant dense<0.000000e+00> : vector<64x128xf32>
    %39 = tpu.matmul %36, %38, %cst_21 {dimension_numbers = #tpu.dot_dimension_numbers<[1], [0], [0], [1], [0, 0, 1, 1], [], []>} : vector<64x128xbf16>, vector<128x128xbf16>, vector<64x128xf32> -> vector<64x128xf32>
    %40 = arith.addf %33, %39 : vector<64x128xf32>
    %41 = vector.extract_strided_slice %0 {offsets = [0, 1, 1, 0], sizes = [1, 8, 8, 128], strides = [1, 1, 1, 1]} : vector<1x10x10x128xbf16> to vector<1x8x8x128xbf16>
    %42 = vector.shape_cast %41 : vector<1x8x8x128xbf16> to vector<8x8x128xbf16>
    %43 = vector.shape_cast %42 : vector<8x8x128xbf16> to vector<64x128xbf16>
    %44 = vector.extract_strided_slice %1 {offsets = [1, 1, 0, 0], sizes = [1, 1, 128, 128], strides = [1, 1, 1, 1]} : vector<3x3x128x128xbf16> to vector<1x1x128x128xbf16>
    %45 = vector.shape_cast %44 : vector<1x1x128x128xbf16> to vector<128x128xbf16>
    %cst_22 = arith.constant dense<0.000000e+00> : vector<64x128xf32>
    %46 = tpu.matmul %43, %45, %cst_22 {dimension_numbers = #tpu.dot_dimension_numbers<[1], [0], [0], [1], [0, 0, 1, 1], [], []>} : vector<64x128xbf16>, vector<128x128xbf16>, vector<64x128xf32> -> vector<64x128xf32>
    %47 = arith.addf %40, %46 : vector<64x128xf32>
    %48 = vector.extract_strided_slice %0 {offsets = [0, 1, 2, 0], sizes = [1, 8, 8, 128], strides = [1, 1, 1, 1]} : vector<1x10x10x128xbf16> to vector<1x8x8x128xbf16>
    %49 = vector.shape_cast %48 : vector<1x8x8x128xbf16> to vector<8x8x128xbf16>
    %50 = vector.shape_cast %49 : vector<8x8x128xbf16> to vector<64x128xbf16>
    %51 = vector.extract_strided_slice %1 {offsets = [1, 2, 0, 0], sizes = [1, 1, 128, 128], strides = [1, 1, 1, 1]} : vector<3x3x128x128xbf16> to vector<1x1x128x128xbf16>
    %52 = vector.shape_cast %51 : vector<1x1x128x128xbf16> to vector<128x128xbf16>
    %cst_23 = arith.constant dense<0.000000e+00> : vector<64x128xf32>
    %53 = tpu.matmul %50, %52, %cst_23 {dimension_numbers = #tpu.dot_dimension_numbers<[1], [0], [0], [1], [0, 0, 1, 1], [], []>} : vector<64x128xbf16>, vector<128x128xbf16>, vector<64x128xf32> -> vector<64x128xf32>
    %54 = arith.addf %47, %53 : vector<64x128xf32>
    %55 = vector.extract_strided_slice %0 {offsets = [0, 2, 0, 0], sizes = [1, 8, 8, 128], strides = [1, 1, 1, 1]} : vector<1x10x10x128xbf16> to vector<1x8x8x128xbf16>
    %56 = vector.shape_cast %55 : vector<1x8x8x128xbf16> to vector<8x8x128xbf16>
    %57 = vector.shape_cast %56 : vector<8x8x128xbf16> to vector<64x128xbf16>
    %58 = vector.extract_strided_slice %1 {offsets = [2, 0, 0, 0], sizes = [1, 1, 128, 128], strides = [1, 1, 1, 1]} : vector<3x3x128x128xbf16> to vector<1x1x128x128xbf16>
    %59 = vector.shape_cast %58 : vector<1x1x128x128xbf16> to vector<128x128xbf16>
    %cst_24 = arith.constant dense<0.000000e+00> : vector<64x128xf32>
    %60 = tpu.matmul %57, %59, %cst_24 {dimension_numbers = #tpu.dot_dimension_numbers<[1], [0], [0], [1], [0, 0, 1, 1], [], []>} : vector<64x128xbf16>, vector<128x128xbf16>, vector<64x128xf32> -> vector<64x128xf32>
    %61 = arith.addf %54, %60 : vector<64x128xf32>
    %62 = vector.extract_strided_slice %0 {offsets = [0, 2, 1, 0], sizes = [1, 8, 8, 128], strides = [1, 1, 1, 1]} : vector<1x10x10x128xbf16> to vector<1x8x8x128xbf16>
    %63 = vector.shape_cast %62 : vector<1x8x8x128xbf16> to vector<8x8x128xbf16>
    %64 = vector.shape_cast %63 : vector<8x8x128xbf16> to vector<64x128xbf16>
    %65 = vector.extract_strided_slice %1 {offsets = [2, 1, 0, 0], sizes = [1, 1, 128, 128], strides = [1, 1, 1, 1]} : vector<3x3x128x128xbf16> to vector<1x1x128x128xbf16>
    %66 = vector.shape_cast %65 : vector<1x1x128x128xbf16> to vector<128x128xbf16>
    %cst_25 = arith.constant dense<0.000000e+00> : vector<64x128xf32>
    %67 = tpu.matmul %64, %66, %cst_25 {dimension_numbers = #tpu.dot_dimension_numbers<[1], [0], [0], [1], [0, 0, 1, 1], [], []>} : vector<64x128xbf16>, vector<128x128xbf16>, vector<64x128xf32> -> vector<64x128xf32>
    %68 = arith.addf %61, %67 : vector<64x128xf32>
    %69 = vector.extract_strided_slice %0 {offsets = [0, 2, 2, 0], sizes = [1, 8, 8, 128], strides = [1, 1, 1, 1]} : vector<1x10x10x128xbf16> to vector<1x8x8x128xbf16>
    %70 = vector.shape_cast %69 : vector<1x8x8x128xbf16> to vector<8x8x128xbf16>
    %71 = vector.shape_cast %70 : vector<8x8x128xbf16> to vector<64x128xbf16>
    %72 = vector.extract_strided_slice %1 {offsets = [2, 2, 0, 0], sizes = [1, 1, 128, 128], strides = [1, 1, 1, 1]} : vector<3x3x128x128xbf16> to vector<1x1x128x128xbf16>
    %73 = vector.shape_cast %72 : vector<1x1x128x128xbf16> to vector<128x128xbf16>
    %cst_26 = arith.constant dense<0.000000e+00> : vector<64x128xf32>
    %74 = tpu.matmul %71, %73, %cst_26 {dimension_numbers = #tpu.dot_dimension_numbers<[1], [0], [0], [1], [0, 0, 1, 1], [], []>} : vector<64x128xbf16>, vector<128x128xbf16>, vector<64x128xf32> -> vector<64x128xf32>
    %75 = arith.addf %68, %74 : vector<64x128xf32>
    %c0_27 = arith.constant 0 : index
    %c0_28 = arith.constant 0 : index
    %76 = vector.load %arg6[%c0_27, %c0_28] : memref<1x128xf32, #tpu.memory_space<vmem>>, vector<1x128xf32>
    %77 = vector.broadcast %76 : vector<1x128xf32> to vector<64x128xf32>
    %78 = arith.mulf %75, %77 : vector<64x128xf32>
    %c0_29 = arith.constant 0 : index
    %c0_30 = arith.constant 0 : index
    %79 = vector.load %arg7[%c0_29, %c0_30] : memref<1x128xf32, #tpu.memory_space<vmem>>, vector<1x128xf32>
    %80 = vector.broadcast %79 : vector<1x128xf32> to vector<64x128xf32>
    %81 = arith.addf %78, %80 : vector<64x128xf32>
    %82 = arith.addf %81, %11 : vector<64x128xf32>
    %cst_31 = arith.constant 0.000000e+00 : f32
    %83 = vector.broadcast %cst_31 : f32 to vector<64x128xf32>
    %84 = arith.maximumf %82, %83 : vector<64x128xf32>
    %85 = vector.shape_cast %84 : vector<64x128xf32> to vector<1x8x8x128xf32>
    %c0_32 = arith.constant 0 : index
    %c0_33 = arith.constant 0 : index
    %c0_34 = arith.constant 0 : index
    %c0_35 = arith.constant 0 : index
    %86 = vector.load %arg10[%c0_32, %c0_33, %c0_34, %c0_35] : memref<1x8x8x128xf32, #tpu.memory_space<vmem>>, vector<1x8x8x128xf32>
    tpu.vector_store %arg10[%c0_32, %c0_33, %c0_34, %c0_35], %85 {strides = array<i32>} : memref<1x8x8x128xf32, #tpu.memory_space<vmem>>, vector<1x8x8x128xf32>,
    return
  }
  func.func @transform_0(%arg0: i32, %arg1: i32) -> (i32, i32, i32, i32) {
    %c0_i32 = arith.constant 0 : i32
    %c0_i32_0 = arith.constant 0 : i32
    %c0_i32_1 = arith.constant 0 : i32
    %c0_i32_2 = arith.constant 0 : i32
    return %arg0, %c0_i32, %c0_i32_0, %c0_i32_1 : i32, i32, i32, i32
  }
  func.func @transform_1(%arg0: i32, %arg1: i32) -> (i32, i32, i32, i32) {
    %c0_i32 = arith.constant 0 : i32
    %c0_i32_0 = arith.constant 0 : i32
    %c0_i32_1 = arith.constant 0 : i32
    %c0_i32_2 = arith.constant 0 : i32
    return %c0_i32, %c0_i32_0, %c0_i32_1, %arg1 : i32, i32, i32, i32
  }
  func.func @transform_2(%arg0: i32, %arg1: i32) -> (i32, i32, i32, i32) {
    %c0_i32 = arith.constant 0 : i32
    %c0_i32_0 = arith.constant 0 : i32
    %c0_i32_1 = arith.constant 0 : i32
    %c0_i32_2 = arith.constant 0 : i32
    return %arg0, %c0_i32, %c0_i32_0, %c0_i32_1 : i32, i32, i32, i32
  }
  func.func @transform_3(%arg0: i32, %arg1: i32) -> (i32, i32) {
    %c0_i32 = arith.constant 0 : i32
    %c0_i32_0 = arith.constant 0 : i32
    return %c0_i32, %arg1 : i32, i32
  }
  func.func @transform_4(%arg0: i32, %arg1: i32) -> (i32, i32) {
    %c0_i32 = arith.constant 0 : i32
    %c0_i32_0 = arith.constant 0 : i32
    return %c0_i32, %arg1 : i32, i32
  }
  func.func @transform_5(%arg0: i32, %arg1: i32) -> (i32, i32) {
    %c0_i32 = arith.constant 0 : i32
    %c0_i32_0 = arith.constant 0 : i32
    return %c0_i32, %arg1 : i32, i32
  }
  func.func @transform_6(%arg0: i32, %arg1: i32) -> (i32, i32) {
    %c0_i32 = arith.constant 0 : i32
    %c0_i32_0 = arith.constant 0 : i32
    return %c0_i32, %arg1 : i32, i32
  }
  func.func @transform_7(%arg0: i32, %arg1: i32) -> (i32, i32) {
    %c0_i32 = arith.constant 0 : i32
    %c0_i32_0 = arith.constant 0 : i32
    return %c0_i32, %arg1 : i32, i32
  }
  func.func @transform_8(%arg0: i32, %arg1: i32) -> (i32, i32, i32, i32) {
    %c0_i32 = arith.constant 0 : i32
    %c0_i32_0 = arith.constant 0 : i32
    %c0_i32_1 = arith.constant 0 : i32
    return %arg0, %c0_i32, %c0_i32_0, %arg1 : i32, i32, i32, i32
  }
}

</mosaic_0001>

<bundles_post_ra>
// kernel: block_b_forward.2
= control target key start
LH: loop header
LB: loop body
LE: loop exit
PB: predicated region body
PF: predicated region fallthrough
CT: control target
= control target key end

     0   :  { %s824_s15 = smov 0   ;;  %s826_s16 = smov 0   ;;  %s900_s0 = inlined_call_operand.vmem [shape: bf16[128,128], index: 0, kind: input, shape index: {}]   ;;  %s901_s1 = inlined_call_operand.vmem [shape: bf16[128,128], index: 1, kind: input, shape index: {}]   ;;  %s902_s2 = inlined_call_operand.vmem [shape: f32[1,128], index: 2, kind: input, shape index: {}]   ;;  %s903_s3 = inlined_call_operand.vmem [shape: f32[1,128], index: 3, kind: input, shape index: {}]   ;;  %s904_s4 = inlined_call_operand.vmem [shape: bf16[128,128], index: 4, kind: output, shape index: {}]  }
   0x1   :  { %s828_s17 = smov 0  }
   0x2 LB: > { %s26_s18 = sadd.s32 1, %s793_s16  ;;  %p627_p0 = scmp.ge.s32.totalorder %s797_s17, 1  ;;  %s797_s17 = sphi %s828_s17, %s14_s17   ;;  %s793_s16 = sphi %s826_s16, %s906_s16   ;;  %s789_s15 = sphi %s824_s15, %s905_s15  }
   0x3   : > { %p28_p1 = scmp.ge.s32.totalorder %s26_s18, 2  ;;  %p202_p2 = scmp.lt.s32.totalorder %s797_s17, 3 }
   0x5   : > { %s908_s18 = smov (%p28_p1, %s26_s18), 0  ;;  %p203_p3 = pnand %p627_p0, %p202_p2 }
   0x6   : > { %s628_s21 = sshll.u32 (!%p203_p3), %s789_s15, 3 }
   0x7   : > { %206 = sbr.rel (%p203_p3) target bundleno = 253 (0xfd), region = 36  ;;  %p242_p4 = scmp.lt.s32.totalorder (!%p203_p3), %s628_s21, 15 }
   0xc   : > { %v763_v0 = vld [vmem:[%s901_s1 + $0x38] sm:$0xff]   ;;  %v764_v1 = vld [vmem:[%s901_s1 + $0x30] sm:$0xff]   ;;  %s910_s21 = smov (!%p242_p4, %s628_s21), 15  ;;  %v765_v2 = vld [vmem:[%s901_s1 + $0x28] sm:$0xff]  }
   0xd   : > { %699 = vmatprep.subr.bf16.mxu0 %v763_v0  ;;  %723 = vmatprep.subr.bf16.mxu1 %v763_v0  ;;  %s629_s26 = sshll.u32 %s910_s21, 2  ;;  %v766_v3 = vld [vmem:[%s901_s1 + $0x20] sm:$0xff]   ;;  %v767_v6 = vld [vmem:[%s901_s1 + $0x18] sm:$0xff]   ;;  %v768_v7 = vld [vmem:[%s901_s1 + $0x10] sm:$0xff]  }
   0xe   : > { %700 = vmatpush3.bf16.msra.mxu0 %v763_v0  ;;  %731 = vmatpush3.bf16.msra.mxu1 %v763_v0  ;;  %s859_s29 = scalar_lea.vmem %s900_s0, %s629_s26  ;;  %v769_v8 = vld [vmem:[%s901_s1 + $0x8] sm:$0xff]   ;;  %v770_v9 = vld [vmem:[%s901_s1] sm:$0xff]   ;;  %s264_s24 = scalar_lea.vmem %s904_s4, %s629_s26 }
   0xf   : > { %701 = vmatprep.subr.bf16.mxu0 %v764_v1  ;;  %724 = vmatprep.subr.bf16.mxu1 %v764_v1  ;;  %v771_v4 = vld [vmem:[%s859_s29] sm:$0xff]   ;;  %v772_v5 = vld [vmem:[%s859_s29 + $0x10] sm:$0xff]   ;;  %v773_v10 = vld [vmem:[%s859_s29 + $0x8] sm:$0xff]  }
  0x10   : > { %715 = vmatprep.mubr.bf16.mxu0 %v771_v4  ;;  %719 = vmatprep.mubr.bf16.mxu1 %v772_v5  ;;  %v774_v11 = vld [vmem:[%s859_s29 + $0x18] sm:$0xff]   ;;  %v644_v12 = vld [vmem:[%s902_s2] ss:$0 sm:$0xff] }
  0x11   : > { %v645_v19 = vld [vmem:[%s903_s3] ss:$0 sm:$0xff] }
  0x12   : > { %702 = vmatpush3.bf16.msra.mxu0 %v764_v1  ;;  %732 = vmatpush3.bf16.msra.mxu1 %v764_v1 }
  0x13   : > { %703 = vmatprep.subr.bf16.mxu0 %v765_v2  ;;  %725 = vmatprep.subr.bf16.mxu1 %v765_v2 }
  0x16   : > { %704 = vmatpush3.bf16.msra.mxu0 %v765_v2  ;;  %733 = vmatpush3.bf16.msra.mxu1 %v765_v2 }
  0x17   : > { %705 = vmatprep.subr.bf16.mxu0 %v766_v3  ;;  %726 = vmatprep.subr.bf16.mxu1 %v766_v3 }
  0x1a   : > { %706 = vmatpush3.bf16.msra.mxu0 %v766_v3  ;;  %734 = vmatpush3.bf16.msra.mxu1 %v766_v3 }
  0x1b   : > { %707 = vmatprep.subr.bf16.mxu0 %v767_v6  ;;  %727 = vmatprep.subr.bf16.mxu1 %v767_v6 }
  0x1e   : > { %708 = vmatpush3.bf16.msra.mxu0 %v767_v6  ;;  %735 = vmatpush3.bf16.msra.mxu1 %v767_v6 }
  0x1f   : > { %709 = vmatprep.subr.bf16.mxu0 %v768_v7  ;;  %728 = vmatprep.subr.bf16.mxu1 %v768_v7 }
  0x22   : > { %710 = vmatpush3.bf16.msra.mxu0 %v768_v7  ;;  %736 = vmatpush3.bf16.msra.mxu1 %v768_v7 }
  0x23   : > { %711 = vmatprep.subr.bf16.mxu0 %v769_v8  ;;  %729 = vmatprep.subr.bf16.mxu1 %v769_v8 }
  0x26   : > { %712 = vmatpush3.bf16.msra.mxu0 %v769_v8  ;;  %737 = vmatpush3.bf16.msra.mxu1 %v769_v8 }
  0x27   : > { %713 = vmatprep.subr.bf16.mxu0 %v770_v9  ;;  %730 = vmatprep.subr.bf16.mxu1 %v770_v9 }
  0x2a   : > { %714 = vmatpush3.bf16.msra.mxu0 %v770_v9  ;;  %738 = vmatpush3.bf16.msra.mxu1 %v770_v9 }
  0x2d   : > { %716 = vmatmul.mubr.bf16.vlgmr.msra.gmra.mxu0 %v773_v10  ;;  %720 = vmatmul.mubr.bf16.vlgmr.msra.gmra.mxu1 %v774_v11 }
  0xed   : > { %v717_v13 = vpop.f32.mrf.mxu0  ;;  %v721_v14 = vpop.f32.mrf.mxu1 }
  0xee   : > { %v437_v15 = vmul.f32 %v717_v13, %v644_v12  ;;  %v441_v16 = vmul.f32 %v721_v14, %v644_v12 }
  0xef   : > { %v397_v17 = vpop.f32.mrf.mxu0  ;;  %v413_v18 = vpop.f32.mrf.mxu1 }
  0xf0   : > { %v435_v20 = vmul.f32 %v644_v12, %v397_v17  ;;  %v439_v21 = vmul.f32 %v644_v12, %v413_v18  ;;  %v452_v24 = vadd.f32 %v645_v19, %v437_v15  ;;  %v456_v25 = vadd.f32 %v645_v19, %v441_v16 }
  0xf1   : > { %v718_v22 = vpop.f32.mrf.mxu0  ;;  %v722_v23 = vpop.f32.mrf.mxu1 }
  0xf2   : > { %v438_v26 = vmul.f32 %v718_v22, %v644_v12  ;;  %v442_v27 = vmul.f32 %v722_v23, %v644_v12  ;;  %v450_v30 = vadd.f32 %v645_v19, %v435_v20  ;;  %v454_v31 = vadd.f32 %v645_v19, %v439_v21 }
  0xf3   : > { %v400_v28 = vpop.f32.mrf.mxu0  ;;  %v416_v29 = vpop.f32.mrf.mxu1  ;;  %v460_v38 = vmax.f32 %v452_v24, 0.0  ;;  %v464_v39 = vmax.f32 %v456_v25, 0.0 }
  0xf4   : > { %v436_v32 = vmul.f32 %v644_v12, %v400_v28  ;;  %v440_v33 = vmul.f32 %v644_v12, %v416_v29  ;;  %v453_v34 = vadd.f32 %v645_v19, %v438_v26  ;;  %v457_v35 = vadd.f32 %v645_v19, %v442_v27 }
  0xf5   : > { %v458_v42 = vmax.f32 %v450_v30, 0.0  ;;  %v462_v43 = vmax.f32 %v454_v31, 0.0 }
  0xf6   : > { %v451_v36 = vadd.f32 %v645_v19, %v436_v32  ;;  %v455_v37 = vadd.f32 %v645_v19, %v440_v33  ;;  %v461_v40 = vmax.f32 %v453_v34, 0.0  ;;  %v465_v41 = vmax.f32 %v457_v35, 0.0 }
  0xf8   : > { %v459_v44 = vmax.f32 %v451_v36, 0.0  ;;  %v463_v45 = vmax.f32 %v455_v37, 0.0  ;;  %v672_v46 = vpack.c.bf16 %v461_v40, %v460_v38  ;;  %v682_v47 = vpack.c.bf16 %v465_v41, %v464_v39 }
  0xfa   : > { %v667_v48 = vpack.c.bf16 %v459_v44, %v458_v42  ;;  %v677_v49 = vpack.c.bf16 %v463_v45, %v462_v43  ;;  %684 = vst [vmem:[%s264_s24 + $0x8] sm:$0xff] %v672_v46   ;;  %686 = vst [vmem:[%s264_s24 + $0x18] sm:$0xff] %v682_v47  }
  0xfc   : > { %668 = vst [vmem:[%s264_s24] sm:$0xff] %v667_v48   ;;  %685 = vst [vmem:[%s264_s24 + $0x10] sm:$0xff] %v677_v49  }
  0xfd PF: > { %s14_s17 = sadd.s32 1, %s797_s17   ;;  %s905_s15 = smov %s793_s16 }
  0xfe   : > { %p11_p5 = scmp.ge.s32.totalorder %s14_s17, 4   ;;  %s906_s16 = smov %s908_s18 }
 0x100   :  { %13 = sbr.rel (!%p11_p5) target bundleno = 2 (0x2), region = 75 }

// kernel: block_b_forward.3
= control target key start
LH: loop header
LB: loop body
LE: loop exit
PB: predicated region body
PF: predicated region fallthrough
CT: control target
= control target key end

     0   :  { %s3069_s27 = smov 0   ;;  %s3071_s28 = smov 0   ;;  %s3742_s0 = inlined_call_operand.vmem [shape: bf16[2,10,10,128], index: 0, kind: input, shape index: {}]   ;;  %s3743_s1 = inlined_call_operand.vmem [shape: bf16[3,3,128,128], index: 1, kind: input, shape index: {}]   ;;  %s3744_s2 = inlined_call_operand.vmem [shape: bf16[2,8,8,128], index: 2, kind: input, shape index: {}]   ;;  %s3745_s3 = inlined_call_operand.vmem [shape: bf16[128,128], index: 3, kind: input, shape index: {}]   ;;  %s3746_s4 = inlined_call_operand.vmem [shape: f32[1,128], index: 4, kind: input, shape index: {}]   ;;  %s3747_s5 = inlined_call_operand.vmem [shape: f32[1,128], index: 5, kind: input, shape index: {}]   ;;  %s3748_s6 = inlined_call_operand.vmem [shape: f32[1,128], index: 6, kind: input, shape index: {}]   ;;  %s3749_s7 = inlined_call_operand.vmem [shape: f32[1,128], index: 7, kind: input, shape index: {}]   ;;  %s3750_s8 = inlined_call_operand.vmem [shape: f32[2,8,8,128], index: 8, kind: output, shape index: {}]  }
   0x1   :  { %s3073_s29 = smov 0  }
   0x2 LB: > { %s30_s30 = sadd.s32 1, %s3018_s28  ;;  %p2387_p0 = scmp.ge.s32.totalorder %s3022_s29, 1  ;;  %s3022_s29 = sphi %s3073_s29, %s18_s29   ;;  %s3018_s28 = sphi %s3071_s28, %s3774_s28   ;;  %s3014_s27 = sphi %s3069_s27, %s3773_s27  }
   0x3   : > { %p32_p1 = scmp.ge.s32.totalorder %s30_s30, 2  ;;  %p336_p2 = scmp.lt.s32.totalorder %s3022_s29, 3 }
   0x5   : > { %s3776_s30 = smov (%p32_p1, %s30_s30), 0  ;;  %p337_p3 = pnand %p2387_p0, %p336_p2 }
   0x7   : > { %340 = sbr.rel (%p337_p3) target bundleno = 393 (0x189), region = 52 }
   0xc   : > { %v2907_v0 = vld [vmem:[%s3745_s3 + $0x38] sm:$0xff]   ;;  %v2909_v2 = vld [vmem:[%s3745_s3 + $0x30] sm:$0xff]   ;;  %p398_p4 = scmp.lt.s32.totalorder %s3014_s27, 1  ;;  %v2911_v4 = vld [vmem:[%s3745_s3 + $0x28] sm:$0xff]   ;;  %vm792_vm0 = vsmask.f32 3328 }
   0xd   : > { %v2908_v1 = vld [vmem:[%s3743_s1 + $0x78] sm:$0xff]   ;;  %2642 = vmatprep.subr.bf16.mxu0 %v2907_v0  ;;  %v2910_v3 = vld [vmem:[%s3743_s1 + $0x70] sm:$0xff]   ;;  %v2912_v5 = vld [vmem:[%s3743_s1 + $0x68] sm:$0xff]   ;;  %vm793_vm1 = vsmask.f32 7440  ;;  %vm1181_vm3 = vcmask 1042432  }
   0xe   : > { %2666 = vmatprep.subr.bf16.mxu1 %v2908_v1  ;;  %2643 = vmatpush3.bf16.msra.mxu0 %v2907_v0  ;;  %s3778_s27 = smov (!%p398_p4, %s3014_s27), 1  ;;  %v2913_v6 = vld [vmem:[%s3745_s3 + $0x20] sm:$0xff]   ;;  %v2915_v8 = vld [vmem:[%s3745_s3 + $0x18] sm:$0xff]   ;;  %v2917_v10 = vld [vmem:[%s3745_s3 + $0x10] sm:$0xff]   ;;  %vm1182_vm4 = vcmask 1046532  }
   0xf   : > { %2667 = vmatpush3.bf16.msra.mxu1 %v2908_v1  ;;  %2644 = vmatprep.subr.bf16.mxu0 %v2909_v2  ;;  %v2914_v7 = vld [vmem:[%s3743_s1 + $0x60] sm:$0xff]   ;;  %s2882_s25 = smul.u32 80, %s3778_s27  ;;  %s2520_s26 = sshll.u32 %s3778_s27, 5  ;;  %v2916_v9 = vld [vmem:[%s3743_s1 + $0x58] sm:$0xff]   ;;  %v2918_v11 = vld [vmem:[%s3743_s1 + $0x50] sm:$0xff]  }
  0x10   : > { %2668 = vmatprep.subr.bf16.mxu1 %v2910_v3  ;;  %s3124_s15 = scalar_lea.vmem %s3744_s2, %s2520_s26  ;;  %v2919_v16 = vld [vmem:[%s3745_s3 + $0x8] sm:$0xff]   ;;  %v2921_v39 = vld [vmem:[%s3745_s3] sm:$0xff]   ;;  %vm3179_vm2 = vmor %vm792_vm0, %vm793_vm1  ;;  %s2521_s12 = sshll.u32 %s3778_s27, 6 }
  0x11   : > { %s3132_s20 = scalar_lea.vmem %s3742_s0, %s2882_s25  ;;  %v2923_v12 = vld [vmem:[%s3124_s15] sm:$0xff]   ;;  %v2920_v20 = vld [vmem:[%s3743_s1 + $0x48] sm:$0xff]   ;;  %v2925_v51 = vld [vmem:[%s3743_s1 + $0x38] sm:$0xff]   ;;  %s3702_s14 = scalar_lea.vmem %s3750_s8, %s2521_s12 }
  0x12   : > { %2645 = vmatpush3.bf16.msra.mxu0 %v2909_v2  ;;  %v3139_v13 = vld [vmem:[%s3132_s20] sm:$0xf]  ;;  %v3142_v14 = vld [vmem:[%s3132_s20 + $0x4] sm:$0x1]  ;;  %v3145_v15 = vld [vmem:[%s3132_s20 + $0x8] sm:$0xf]  ;;  %2658 = vmatprep.mubr.bf16.mxu0 %v2923_v12 }
  0x13   : > { %2669 = vmatpush3.bf16.msra.mxu1 %v2910_v3  ;;  %2646 = vmatprep.subr.bf16.mxu0 %v2911_v4  ;;  %v3151_v17 = vld [vmem:[%s3132_s20 + $0xc] sm:$0x1]  ;;  %v3154_v18 = vld [vmem:[%s3132_s20 + $0x10] sm:$0xf]  ;;  %v3157_v19 = vld [vmem:[%s3132_s20 + $0x14] sm:$0x1] }
  0x14   : > { %2670 = vmatprep.subr.bf16.mxu1 %v2912_v5  ;;  %v796_v21 = vshrl.u32 %v3139_v13, 16  ;;  %v799_v22 = vshll.u32 %v3139_v13, 16  ;;  %v805_v23 = vshll.u32 %v3142_v14, 16  ;;  %v810_v24 = vshrl.u32 %v3145_v15, 16  ;;  %v3172_v38 = vld [vmem:[%s3132_s20 + $0x18] sm:$0xf]  ;;  %vm3293_vm5 = vmor %vm1181_vm3, %vm1182_vm4 }
  0x15   : > { %v813_v25 = vshll.u32 %v3145_v15, 16  ;;  %v819_v26 = vshll.u32 %v3151_v17, 16  ;;  %v824_v29 = vshrl.u32 %v3154_v18, 16  ;;  %v827_v30 = vshll.u32 %v3154_v18, 16  ;;  %v3184_v43 = vld [vmem:[%s3132_s20 + $0x1c] sm:$0x1] }
  0x16   : > { %2647 = vmatpush3.bf16.msra.mxu0 %v2911_v4  ;;  %v798_v27 = vrot.slane %v796_v21, 4  ;;  %v801_v28 = vrot.slane %v799_v22, 5  ;;  %v807_v31 = vrot.slane %v805_v23, 5  ;;  %v812_v32 = vrot.slane %v810_v24, 4  ;;  %v2922_v44 = vld [vmem:[%s3743_s1 + $0x40] sm:$0xff]   ;;  %v2926_v55 = vld [vmem:[%s3743_s1 + $0xb8] sm:$0xff]  }
  0x17   : > { %2671 = vmatpush3.bf16.msra.mxu1 %v2912_v5  ;;  %2648 = vmatprep.subr.bf16.mxu0 %v2913_v6  ;;  %v815_v33 = vrot.slane %v813_v25, 5  ;;  %v826_v35 = vrot.slane %v824_v29, 4  ;;  %v829_v36 = vrot.slane %v827_v30, 5  ;;  %v833_v37 = vshll.u32 %v3157_v19, 16  ;;  %v2924_v60 = vld [vmem:[%s3124_s15 + $0x8] sm:$0xff]   ;;  %v2927_v1 = vld [vmem:[%s3743_s1 + $0x30] sm:$0xff]  }
  0x18   : > { %2672 = vmatprep.subr.bf16.mxu1 %v2914_v7  ;;  %v802_v34 = vor.u32 %v801_v28, %v798_v27  ;;  %v821_v42 = vrot.slane %v819_v26, 5  ;;  %v838_v47 = vshrl.u32 %v3172_v38, 16  ;;  %v841_v49 = vshll.u32 %v3172_v38, 16  ;;  %v2928_v3 = vld [vmem:[%s3743_s1 + $0xb0] sm:$0xff]   ;;  %v2929_v5 = vld [vmem:[%s3743_s1 + $0x28] sm:$0xff]   ;;  %v2931_v25 = vld [vmem:[%s3743_s1 + $0x20] sm:$0xff]  }
  0x19   : > { %v816_v41 = vor.u32 %v815_v33, %v812_v32  ;;  %v830_v46 = vor.u32 %v829_v36, %v826_v35  ;;  %v847_v50 = vshll.u32 %v3184_v43, 16  ;;  %v835_v53 = vrot.slane %v833_v37, 5  ;;  %v3239_v12 = vld [vmem:[%s3132_s20 + $0x24] sm:$0x1]  ;;  %v3263_v37 = vld [vmem:[%s3132_s20 + $0x30] sm:$0xf] }
  0x1a   : > { %2649 = vmatpush3.bf16.msra.mxu0 %v2913_v6  ;;  %v803_v45 = vrot.slane %v802_v34, 4  ;;  %v840_v54 = vrot.slane %v838_v47, 4  ;;  %v843_v58 = vrot.slane %v841_v49, 5  ;;  %v1186_v6 = vrot.slane %v3142_v14, 5  ;;  %v2932_v30 = vld [vmem:[%s3743_s1 + $0xa0] sm:$0xff]  }
  0x1b   : > { %2673 = vmatpush3.bf16.msra.mxu1 %v2914_v7  ;;  %2650 = vmatprep.subr.bf16.mxu0 %v2915_v8  ;;  %v817_v48 = vrot.slane %v816_v41, 4  ;;  %v831_v57 = vrot.slane %v830_v46, 4  ;;  %v849_v62 = vrot.slane %v847_v50, 5  ;;  %v2935_v7 = vld [vmem:[%s3124_s15 + $0x10] sm:$0xff]   ;;  %v861_v23 = vshll.u32 %v3239_v12, 16 }
  0x1c   : > { %2674 = vmatprep.subr.bf16.mxu1 %v2916_v9  ;;  %v808_v52 = vsel %vm3179_vm2, %v803_v45, %v807_v31  ;;  %v844_v61 = vor.u32 %v843_v58, %v840_v54  ;;  %v2419_v28 = vcombine.low %v3139_v13, %v3145_v15  ;;  %v2431_v29 = vrot.slane %v3139_v13, 9  ;;  %v3266_v41 = vld [vmem:[%s3132_s20 + $0x34] sm:$0x1]  ;;  %v3269_v13 = vld [vmem:[%s3132_s20 + $0x38] sm:$0xf] }
  0x1d   : > { %v3202_v56 = vsel %vm3179_vm2, %v817_v48, %v821_v42  ;;  %v3208_v63 = vsel %vm3179_vm2, %v831_v57, %v835_v53  ;;  %v863_v33 = vrot.slane %v861_v23, 5  ;;  %v3272_v42 = vld [vmem:[%s3132_s20 + $0x3c] sm:$0x1]  ;;  %v880_v46 = vshrl.u32 %v3263_v37, 16 }
  0x1e   : > { %2651 = vmatpush3.bf16.msra.mxu0 %v2915_v8  ;;  %v2407_v59 = vcombine.low %v808_v52, %v3202_v56  ;;  %v845_v0 = vrot.slane %v844_v61, 4  ;;  %v1190_v8 = vrot.slane %v3151_v17, 5  ;;  %v883_v47 = vshll.u32 %v3263_v37, 16  ;;  %v2934_v58 = vld [vmem:[%s3743_s1 + $0x98] sm:$0xff]   ;;  %v2939_v17 = vld [vmem:[%s3743_s1 + $0x8] sm:$0xff]  }
  0x1f   : > { %2675 = vmatpush3.bf16.msra.mxu1 %v2916_v9  ;;  %2652 = vmatprep.subr.bf16.mxu0 %v2917_v10  ;;  %v2930_v9 = vld [vmem:[%s3743_s1 + $0xa8] sm:$0xff]   ;;  %v889_v48 = vshll.u32 %v3266_v41, 16  ;;  %v894_v50 = vshrl.u32 %v3269_v13, 16  ;;  %v903_v52 = vshll.u32 %v3272_v42, 16  ;;  %v882_v54 = vrot.slane %v880_v46, 4 }
  0x20   : > { %2676 = vmatprep.subr.bf16.mxu1 %v2918_v11  ;;  %2682 = vmatprep.mubr.bf16.mxu1 %v2407_v59  ;;  %v3215_v2 = vsel %vm3179_vm2, %v845_v0, %v849_v62  ;;  %v2432_v57 = vrot.slane %v3145_v15, 9 }
  0x21   : > { %v3222_v4 = vcombine.low %v3208_v63, %v3215_v2 }
  0x22   : > { %2653 = vmatpush3.bf16.msra.mxu0 %v2917_v10  ;;  %v2936_v10 = vld [vmem:[%s3124_s15 + $0x18] sm:$0xff]   ;;  %v3316_v23 = vsel %vm3293_vm5, %v2432_v57, %v1190_v8  ;;  %v3412_v57 = vcombine.low %v3263_v37, %v3269_v13 }
  0x23   : > { %2677 = vmatpush3.bf16.msra.mxu1 %v2918_v11  ;;  %2654 = vmatprep.subr.bf16.mxu0 %v2919_v16  ;;  %v3236_v11 = vld [vmem:[%s3132_s20 + $0x20] sm:$0xf] }
  0x24   : > { %2678 = vmatprep.subr.bf16.mxu1 %v2920_v20  ;;  %v852_v21 = vshrl.u32 %v3236_v11, 16  ;;  %v855_v22 = vshll.u32 %v3236_v11, 16 }
  0x26   : > { %2655 = vmatpush3.bf16.msra.mxu0 %v2919_v16  ;;  %v3242_v16 = vld [vmem:[%s3132_s20 + $0x28] sm:$0xf]  ;;  %v854_v31 = vrot.slane %v852_v21, 4  ;;  %v857_v32 = vrot.slane %v855_v22, 5  ;;  %v1187_v22 = vsel %vm3293_vm5, %v2431_v29, %v1186_v6  ;;  %v1198_v29 = vrot.slane %v3184_v43, 5 }
  0x27   : > { %2679 = vmatpush3.bf16.msra.mxu1 %v2920_v20  ;;  %2656 = vmatprep.subr.bf16.mxu0 %v2921_v39  ;;  %v3245_v20 = vld [vmem:[%s3132_s20 + $0x2c] sm:$0x1]  ;;  %v866_v24 = vshrl.u32 %v3242_v16, 16  ;;  %v869_v26 = vshll.u32 %v3242_v16, 16  ;;  %v2439_v8 = vcombine.low %v1187_v22, %v3316_v23  ;;  %v1202_v43 = vrot.slane %v3239_v12, 5 }
  0x28   : > { %2680 = vmatprep.subr.bf16.mxu1 %v2922_v44  ;;  %v875_v27 = vshll.u32 %v3245_v20, 16 }
  0x29   : > { %v868_v34 = vrot.slane %v866_v24, 4  ;;  %v871_v35 = vrot.slane %v869_v26, 5  ;;  %v2938_v24 = vld [vmem:[%s3743_s1 + $0x90] sm:$0xff]  }
  0x2a   : > { %2657 = vmatpush3.bf16.msra.mxu0 %v2921_v39  ;;  %v877_v36 = vrot.slane %v875_v27, 5  ;;  %v858_v39 = vor.u32 %v857_v32, %v854_v31  ;;  %v1194_v27 = vrot.slane %v3157_v19, 5  ;;  %v2433_v31 = vrot.slane %v3154_v18, 9  ;;  %v2942_v19 = vld [vmem:[%s3743_s1 + $0x80] sm:$0xff]  }
  0x2b   : > { %2681 = vmatpush3.bf16.msra.mxu1 %v2922_v44  ;;  %2690 = vmatprep.subr.bf16.mxu0 %v2925_v51  ;;  %v2933_v44 = vld [vmem:[%s3743_s1 + $0x18] sm:$0xff]   ;;  %v872_v45 = vor.u32 %v871_v35, %v868_v34  ;;  %v2434_v32 = vrot.slane %v3172_v38, 9  ;;  %v2436_v34 = vrot.slane %v3242_v16, 9  ;;  %v1206_v35 = vrot.slane %v3245_v20, 5 }
  0x2c   : > { %2714 = vmatprep.subr.bf16.mxu1 %v2926_v55  ;;  %v859_v49 = vrot.slane %v858_v39, 4  ;;  %v3361_v39 = vcombine.low %v3154_v18, %v3172_v38  ;;  %v2946_v20 = vld [vmem:[%s3743_s1 + $0x138] sm:$0xff]  }
  0x2d   : > { %2659 = vmatmul.mubr.bf16.vlgmr.msra.gmra.mxu0 %v2924_v60  ;;  %v873_v53 = vrot.slane %v872_v45, 4  ;;  %v896_v60 = vrot.slane %v894_v50, 4  ;;  %v3369_v12 = vsel %vm3293_vm5, %v2434_v32, %v1198_v29  ;;  %v3380_v46 = vsel %vm3293_vm5, %v2436_v34, %v1206_v35 }
  0x2e   : > { %2691 = vmatpush3.bf16.msra.mxu0 %v2925_v51  ;;  %2683 = vmatmul.mubr.bf16.vlgmr.msra.gmra.mxu1 %v3222_v4  ;;  %v897_v51 = vshll.u32 %v3269_v13, 16  ;;  %v3289_v59 = vsel %vm3179_vm2, %v859_v49, %v863_v33  ;;  %v2435_v33 = vrot.slane %v3236_v11, 9  ;;  %v2437_v50 = vrot.slane %v3263_v37, 9 }
  0x2f   : > { %2692 = vmatprep.subr.bf16.mxu0 %v2927_v1  ;;  %2715 = vmatpush3.bf16.msra.mxu1 %v2926_v55  ;;  %v885_v55 = vrot.slane %v883_v47, 5  ;;  %v3299_v0 = vsel %vm3179_vm2, %v873_v53, %v877_v36  ;;  %v2945_v36 = vld [vmem:[%s3743_s1 + $0xf8] sm:$0xff]   ;;  %v2947_v47 = vld [vmem:[%s3743_s1 + $0xf0] sm:$0xff]   ;;  %v2438_v53 = vrot.slane %v3269_v13, 9  ;;  %v2453_v34 = vcombine.low %v3242_v16, %v3263_v37 }
  0x30   : > { %2662 = vmatprep.mubr.bf16.mxu0 %v2935_v7  ;;  %2716 = vmatprep.subr.bf16.mxu1 %v2928_v3  ;;  %v899_v61 = vrot.slane %v897_v51, 5  ;;  %v3306_v7 = vcombine.low %v3289_v59, %v3299_v0  ;;  %v3376_v45 = vsel %vm3293_vm5, %v2435_v33, %v1202_v43  ;;  %v1210_v51 = vrot.slane %v3266_v41, 5  ;;  %v2951_v41 = vld [vmem:[%s3743_s1 + $0xe8] sm:$0xff]   ;;  %v2966_v33 = vld [vmem:[%s3743_s1 + $0x1b8] sm:$0xff]   ;;  %v2967_v43 = vld [vmem:[%s3743_s1 + $0x170] sm:$0xff]  }
  0x32   : > { %2693 = vmatpush3.bf16.msra.mxu0 %v2927_v1  ;;  %v2937_v1 = vld [vmem:[%s3743_s1 + $0x10] sm:$0xff]   ;;  %2686 = vmatprep.mubr.bf16.mxu1 %v3306_v7 }
  0x33   : > { %2694 = vmatprep.subr.bf16.mxu0 %v2929_v5  ;;  %2717 = vmatpush3.bf16.msra.mxu1 %v2928_v3  ;;  %v886_v3 = vor.u32 %v885_v55, %v882_v54  ;;  %v1214_v54 = vrot.slane %v3272_v42, 5  ;;  %v2948_v55 = vld [vmem:[%s3743_s1 + $0x130] sm:$0xff]   ;;  %v3417_v42 = vsel %vm3293_vm5, %v2437_v50, %v1210_v51  ;;  %v2975_v50 = vld [vmem:[%s3743_s1 + $0x158] sm:$0xff]   ;;  %v2980_v51 = vld [vmem:[%s3743_s1 + $0x188] sm:$0xff]  }
  0x34   : > { %2718 = vmatprep.subr.bf16.mxu1 %v2930_v9 }
  0x35   : > { %2663 = vmatmul.mubr.bf16.gmra.mxu0 %v2936_v10  ;;  %v905_v10 = vrot.slane %v903_v52, 5  ;;  %v887_v21 = vrot.slane %v886_v3, 4  ;;  %v3398_v52 = vcombine.low %v3376_v45, %v3380_v46 }
  0x36   : > { %2695 = vmatpush3.bf16.msra.mxu0 %v2929_v5  ;;  %2706 = vmatprep.mubr.bf16.mxu0 %v2419_v28  ;;  %v891_v5 = vrot.slane %v889_v48, 5  ;;  %v2940_v28 = vld [vmem:[%s3743_s1 + $0x88] sm:$0xff]   ;;  %v3387_v48 = vcombine.low %v3236_v11, %v3242_v16 }
  0x37   : > { %2696 = vmatprep.subr.bf16.mxu0 %v2931_v25  ;;  %2719 = vmatpush3.bf16.msra.mxu1 %v2930_v9  ;;  %v900_v9 = vor.u32 %v899_v61, %v896_v60  ;;  %v2952_v60 = vld [vmem:[%s3743_s1 + $0x128] sm:$0xff]   ;;  %v2953_v61 = vld [vmem:[%s3743_s1 + $0xe0] sm:$0xff]  }
  0x38   : > { %2720 = vmatprep.subr.bf16.mxu1 %v2932_v30  ;;  %v3324_v14 = vsel %vm3179_vm2, %v887_v21, %v891_v5  ;;  %v2463_v5 = vcombine.low %v3202_v56, %v3208_v63  ;;  %v2957_v56 = vld [vmem:[%s3743_s1 + $0xd0] sm:$0xff]   ;;  %v2959_v21 = vld [vmem:[%s3743_s1 + $0xc8] sm:$0xff]  }
  0x39   : > { %v2958_v63 = vld [vmem:[%s3743_s1 + $0x110] sm:$0xff]   ;;  %v2971_v16 = vld [vmem:[%s3743_s1 + $0x168] sm:$0xff]  }
  0x3a   : > { %2697 = vmatpush3.bf16.msra.mxu0 %v2931_v25  ;;  %v901_v25 = vrot.slane %v900_v9, 4  ;;  %v2954_v9 = vld [vmem:[%s3743_s1 + $0x120] sm:$0xff]  }
  0x3b   : > { %2698 = vmatprep.subr.bf16.mxu0 %v2933_v44  ;;  %2721 = vmatpush3.bf16.msra.mxu1 %v2932_v30  ;;  %v2941_v30 = vld [vmem:[%s3743_s1] sm:$0xff]  }
  0x3c   : > { %2722 = vmatprep.subr.bf16.mxu1 %v2934_v58  ;;  %v3331_v6 = vsel %vm3179_vm2, %v901_v25, %v905_v10  ;;  %v3455_v10 = vld [vmem:[%s3132_s20 + $0x40] sm:$0xf]  ;;  %v2960_v25 = vld [vmem:[%s3743_s1 + $0x108] sm:$0xff]  }
  0x3d   : > { %v3336_v26 = vcombine.low %v3324_v14, %v3331_v6  ;;  %v1485_v22 = vshrl.u32 %v3455_v10, 16 }
  0x3e   : > { %2699 = vmatpush3.bf16.msra.mxu0 %v2933_v44  ;;  %v3365_v44 = vsel %vm3293_vm5, %v2433_v31, %v1194_v27  ;;  %v3472_v27 = vld [vmem:[%s3132_s20 + $0x44] sm:$0x1]  ;;  %v2452_v31 = vcombine.low %v3172_v38, %v3236_v11  ;;  %v2464_v38 = vcombine.low %v3215_v2, %v3289_v59  ;;  %v2465_v11 = vcombine.low %v3299_v0, %v3324_v14  ;;  %v2972_v59 = vld [vmem:[%s3743_s1 + $0x1a8] sm:$0xff]  }
  0x3f   : > { %2700 = vmatprep.subr.bf16.mxu0 %v2937_v1  ;;  %2723 = vmatpush3.bf16.msra.mxu1 %v2934_v58  ;;  %v3391_v49 = vcombine.low %v3365_v44, %v3369_v12  ;;  %v3421_v58 = vsel %vm3293_vm5, %v2438_v53, %v1214_v54  ;;  %v2454_v2 = vcombine.low %v3269_v13, %v3455_v10  ;;  %v2973_v0 = vld [vmem:[%s3743_s1 + $0x160] sm:$0xff]  }
  0x40   : > { %2724 = vmatprep.subr.bf16.mxu1 %v2938_v24  ;;  %2687 = vmatmul.mubr.bf16.gmra.mxu1 %v3336_v26  ;;  %v3433_v3 = vcombine.low %v3417_v42, %v3421_v58  ;;  %v2476_v14 = vcombine.low %v3316_v23, %v3365_v44  ;;  %v2976_v23 = vld [vmem:[%s3743_s1 + $0x198] sm:$0xff]   ;;  %v2978_v44 = vld [vmem:[%s3743_s1 + $0x190] sm:$0xff]   ;;  %v2981_v53 = vld [vmem:[%s3743_s1 + $0x140] sm:$0xff]  }
  0x41   : > { %2730 = vmatprep.mubr.bf16.mxu1 %v2439_v8  ;;  %v2962_v8 = vld [vmem:[%s3743_s1 + $0x100] sm:$0xff]  }
  0x42   : > { %2701 = vmatpush3.bf16.msra.mxu0 %v2937_v1  ;;  %v2451_v1 = vcombine.low %v3145_v15, %v3154_v18  ;;  %v2955_v15 = vld [vmem:[%s3743_s1 + $0xd8] sm:$0xff]   ;;  %v2982_v54 = vld [vmem:[%s3743_s1 + $0x180] sm:$0xff]  }
  0x43   : > { %2702 = vmatprep.subr.bf16.mxu0 %v2939_v17  ;;  %2725 = vmatpush3.bf16.msra.mxu1 %v2938_v24  ;;  %v2956_v18 = vld [vmem:[%s3743_s1 + $0x118] sm:$0xff]   ;;  %v1488_v24 = vshll.u32 %v3455_v10, 16 }
  0x44   : > { %2726 = vmatprep.subr.bf16.mxu1 %v2940_v28 }
  0x45   : > { %v1490_v29 = vrot.slane %v1488_v24, 5  ;;  %v2997_v24 = vld [vmem:[%s3743_s1 + $0x208] sm:$0xff]  }
  0x46   : > { %2703 = vmatpush3.bf16.msra.mxu0 %v2939_v17  ;;  %v2961_v17 = vld [vmem:[%s3743_s1 + $0xc0] sm:$0xff]  }
  0x47   : > { %2704 = vmatprep.subr.bf16.mxu0 %v2941_v30  ;;  %2727 = vmatpush3.bf16.msra.mxu1 %v2940_v28  ;;  %v1487_v28 = vrot.slane %v1485_v22, 4  ;;  %v2996_v22 = vld [vmem:[%s3743_s1 + $0x1c8] sm:$0xff]  }
  0x48   : > { %2728 = vmatprep.subr.bf16.mxu1 %v2942_v19 }
  0x49   : > { %v1491_v32 = vor.u32 %v1490_v29, %v1487_v28  ;;  %v2999_v28 = vld [vmem:[%s3743_s1 + $0x200] sm:$0xff]  }
  0x4a   : > { %2705 = vmatpush3.bf16.msra.mxu0 %v2941_v30  ;;  %v2965_v30 = vld [vmem:[%s3743_s1 + $0x178] sm:$0xff]  }
  0x4b   : > { %2738 = vmatprep.subr.bf16.mxu0 %v2945_v36  ;;  %2729 = vmatpush3.bf16.msra.mxu1 %v2942_v19  ;;  %v1494_v19 = vshll.u32 %v3472_v27, 16  ;;  %v1492_v35 = vrot.slane %v1491_v32, 4 }
  0x4c   : > { %2762 = vmatprep.subr.bf16.mxu1 %v2946_v20 }
  0x4d   : > { %2707 = vmatmul.mubr.bf16.vlgmr.msra.gmra.mxu0 %v3361_v39 }
  0x4e   : > { %2739 = vmatpush3.bf16.msra.mxu0 %v2945_v36  ;;  %2710 = vmatprep.mubr.bf16.mxu0 %v3387_v48  ;;  %v1496_v36 = vrot.slane %v1494_v19, 5 }
  0x4f   : > { %2740 = vmatprep.subr.bf16.mxu0 %v2947_v47  ;;  %2731 = vmatmul.mubr.bf16.vlgmr.msra.gmra.mxu1 %v3391_v49 }
  0x50   : > { %2763 = vmatpush3.bf16.msra.mxu1 %v2946_v20  ;;  %2734 = vmatprep.mubr.bf16.mxu1 %v3398_v52  ;;  %v2968_v20 = vld [vmem:[%s3743_s1 + $0x1b0] sm:$0xff]   ;;  %v3502_v37 = vsel %vm3179_vm2, %v1492_v35, %v1496_v36 }
  0x51   : > { %2764 = vmatprep.subr.bf16.mxu1 %v2948_v55  ;;  %v2466_v13 = vcombine.low %v3331_v6, %v3502_v37  ;;  %v2977_v6 = vld [vmem:[%s3743_s1 + $0x150] sm:$0xff]  }
  0x52   : > { %2741 = vmatpush3.bf16.msra.mxu0 %v2947_v47  ;;  %v2974_v47 = vld [vmem:[%s3743_s1 + $0x1a0] sm:$0xff]  }
  0x53   : > { %2742 = vmatprep.subr.bf16.mxu0 %v2951_v41 }
  0x54   : > { %2765 = vmatpush3.bf16.msra.mxu1 %v2948_v55  ;;  %v2983_v55 = vld [vmem:[%s3743_s1 + $0x1f8] sm:$0xff]  }
  0x55   : > { %2711 = vmatmul.mubr.bf16.gmra.mxu0 %v3412_v57  ;;  %2766 = vmatprep.subr.bf16.mxu1 %v2952_v60 }
  0x56   : > { %2743 = vmatpush3.bf16.msra.mxu0 %v2951_v41  ;;  %2754 = vmatprep.mubr.bf16.mxu0 %v2451_v1  ;;  %v2477_v41 = vcombine.low %v3369_v12, %v3376_v45  ;;  %v1631_v1 = vrot.slane %v3472_v27, 5  ;;  %v2478_v12 = vcombine.low %v3380_v46, %v3417_v42  ;;  %v2986_v45 = vld [vmem:[%s3743_s1 + $0x230] sm:$0xff]   ;;  %v3572_v42 = vld [vmem:[%s3132_s20 + $0x48] sm:$0xf]  ;;  %v456_v27 = vld [vmem:[%s3132_s20 + $0x4c] sm:$0x1] }
  0x57   : > { %2744 = vmatprep.subr.bf16.mxu0 %v2953_v61  ;;  %2735 = vmatmul.mubr.bf16.gmra.mxu1 %v3433_v3  ;;  %v2506_v19 = vrot.slane %v3572_v42, 9 }
  0x58   : > { %2767 = vmatpush3.bf16.msra.mxu1 %v2952_v60  ;;  %2778 = vmatprep.mubr.bf16.mxu1 %v2463_v5  ;;  %v2984_v60 = vld [vmem:[%s3743_s1 + $0x238] sm:$0xff]   ;;  %v2985_v5 = vld [vmem:[%s3743_s1 + $0x1f0] sm:$0xff]  }
  0x59   : > { %2768 = vmatprep.subr.bf16.mxu1 %v2954_v9 }
  0x5a   : > { %2745 = vmatpush3.bf16.msra.mxu0 %v2953_v61  ;;  %v2475_v61 = vrot.slane %v3455_v10, 9 }
  0x5b   : > { %2746 = vmatprep.subr.bf16.mxu0 %v2955_v15 }
  0x5c   : > { %2769 = vmatpush3.bf16.msra.mxu1 %v2954_v9  ;;  %v3562_v9 = vsel %vm3293_vm5, %v2475_v61, %v1631_v1 }
  0x5d   : > { %2770 = vmatprep.subr.bf16.mxu1 %v2956_v18  ;;  %v2479_v46 = vcombine.low %v3421_v58, %v3562_v9  ;;  %v2992_v58 = vld [vmem:[%s3743_s1 + $0x1d8] sm:$0xff]  }
  0x5e   : > { %2747 = vmatpush3.bf16.msra.mxu0 %v2955_v15  ;;  %v2987_v15 = vld [vmem:[%s3743_s1 + $0x1e8] sm:$0xff]  }
  0x5f   : > { %2748 = vmatprep.subr.bf16.mxu0 %v2957_v56 }
  0x60   : > { %2771 = vmatpush3.bf16.msra.mxu1 %v2956_v18  ;;  %v2988_v18 = vld [vmem:[%s3743_s1 + $0x228] sm:$0xff]  }
  0x61   : > { %2772 = vmatprep.subr.bf16.mxu1 %v2958_v63 }
  0x62   : > { %2749 = vmatpush3.bf16.msra.mxu0 %v2957_v56  ;;  %v2990_v56 = vld [vmem:[%s3743_s1 + $0x1e0] sm:$0xff]  }
  0x63   : > { %2750 = vmatprep.subr.bf16.mxu0 %v2959_v21 }
  0x64   : > { %2773 = vmatpush3.bf16.msra.mxu1 %v2958_v63  ;;  %v2993_v63 = vld [vmem:[%s3743_s1 + $0x218] sm:$0xff]  }
  0x65   : > { %2774 = vmatprep.subr.bf16.mxu1 %v2960_v25 }
  0x66   : > { %2751 = vmatpush3.bf16.msra.mxu0 %v2959_v21  ;;  %v1889_v21 = vshrl.u32 %v3572_v42, 16 }
  0x67   : > { %2752 = vmatprep.subr.bf16.mxu0 %v2961_v17 }
  0x68   : > { %2775 = vmatpush3.bf16.msra.mxu1 %v2960_v25  ;;  %v1891_v25 = vrot.slane %v1889_v21, 4 }
  0x69   : > { %2776 = vmatprep.subr.bf16.mxu1 %v2962_v8 }
  0x6a   : > { %2753 = vmatpush3.bf16.msra.mxu0 %v2961_v17 }
  0x6b   : > { %2786 = vmatprep.subr.bf16.mxu0 %v2965_v30 }
  0x6c   : > { %2777 = vmatpush3.bf16.msra.mxu1 %v2962_v8  ;;  %v2998_v8 = vld [vmem:[%s3743_s1 + $0x1c0] sm:$0xff]  }
  0x6d   : > { %2755 = vmatmul.mubr.bf16.vlgmr.msra.gmra.mxu0 %v2452_v31  ;;  %2810 = vmatprep.subr.bf16.mxu1 %v2966_v33 }
  0x6e   : > { %2787 = vmatpush3.bf16.msra.mxu0 %v2965_v30  ;;  %2758 = vmatprep.mubr.bf16.mxu0 %v2453_v34  ;;  %v1898_v30 = vshll.u32 %v456_v27, 16 }
  0x6f   : > { %2788 = vmatprep.subr.bf16.mxu0 %v2967_v43  ;;  %2779 = vmatmul.mubr.bf16.vlgmr.msra.gmra.mxu1 %v2464_v38 }
  0x70   : > { %2811 = vmatpush3.bf16.msra.mxu1 %v2966_v33  ;;  %2782 = vmatprep.mubr.bf16.mxu1 %v2465_v11  ;;  %v1900_v32 = vrot.slane %v1898_v30, 5  ;;  %v2029_v33 = vrot.slane %v456_v27, 5 }
  0x71   : > { %2812 = vmatprep.subr.bf16.mxu1 %v2968_v20 }
  0x72   : > { %2789 = vmatpush3.bf16.msra.mxu0 %v2967_v43  ;;  %v2030_v38 = vsel %vm3293_vm5, %v2506_v19, %v2029_v33 }
  0x73   : > { %2790 = vmatprep.subr.bf16.mxu0 %v2971_v16  ;;  %v2507_v11 = vcombine.low %v3562_v9, %v2030_v38 }
  0x74   : > { %2813 = vmatpush3.bf16.msra.mxu1 %v2968_v20 }
  0x75   : > { %2759 = vmatmul.mubr.bf16.gmra.mxu0 %v2454_v2  ;;  %2814 = vmatprep.subr.bf16.mxu1 %v2972_v59 }
  0x76   : > { %2791 = vmatpush3.bf16.msra.mxu0 %v2971_v16  ;;  %2802 = vmatprep.mubr.bf16.mxu0 %v2476_v14 }
  0x77   : > { %2792 = vmatprep.subr.bf16.mxu0 %v2973_v0  ;;  %2783 = vmatmul.mubr.bf16.gmra.mxu1 %v2466_v13 }
  0x78   : > { %2815 = vmatpush3.bf16.msra.mxu1 %v2972_v59  ;;  %2826 = vmatprep.mubr.bf16.mxu1 %v3361_v39  ;;  %v2979_v39 = vld [vmem:[%s3743_s1 + $0x148] sm:$0xff]  }
  0x79   : > { %2816 = vmatprep.subr.bf16.mxu1 %v2974_v47 }
  0x7a   : > { %2793 = vmatpush3.bf16.msra.mxu0 %v2973_v0 }
  0x7b   : > { %2794 = vmatprep.subr.bf16.mxu0 %v2975_v50 }
  0x7c   : > { %2817 = vmatpush3.bf16.msra.mxu1 %v2974_v47 }
  0x7d   : > { %2818 = vmatprep.subr.bf16.mxu1 %v2976_v23 }
  0x7e   : > { %2795 = vmatpush3.bf16.msra.mxu0 %v2975_v50 }
  0x7f   : > { %2796 = vmatprep.subr.bf16.mxu0 %v2977_v6 }
  0x80   : > { %2819 = vmatpush3.bf16.msra.mxu1 %v2976_v23 }
  0x81   : > { %2820 = vmatprep.subr.bf16.mxu1 %v2978_v44 }
  0x82   : > { %2797 = vmatpush3.bf16.msra.mxu0 %v2977_v6 }
  0x83   : > { %2798 = vmatprep.subr.bf16.mxu0 %v2979_v39 }
  0x84   : > { %2821 = vmatpush3.bf16.msra.mxu1 %v2978_v44 }
  0x85   : > { %2822 = vmatprep.subr.bf16.mxu1 %v2980_v51 }
  0x86   : > { %2799 = vmatpush3.bf16.msra.mxu0 %v2979_v39 }
  0x87   : > { %2800 = vmatprep.subr.bf16.mxu0 %v2981_v53 }
  0x88   : > { %2823 = vmatpush3.bf16.msra.mxu1 %v2980_v51 }
  0x89   : > { %2824 = vmatprep.subr.bf16.mxu1 %v2982_v54 }
  0x8a   : > { %2801 = vmatpush3.bf16.msra.mxu0 %v2981_v53 }
  0x8b   : > { %2834 = vmatprep.subr.bf16.mxu0 %v2983_v55 }
  0x8c   : > { %2825 = vmatpush3.bf16.msra.mxu1 %v2982_v54 }
  0x8d   : > { %2803 = vmatmul.mubr.bf16.vlgmr.msra.gmra.mxu0 %v2477_v41  ;;  %2858 = vmatprep.subr.bf16.mxu1 %v2984_v60 }
  0x8e   : > { %2835 = vmatpush3.bf16.msra.mxu0 %v2983_v55  ;;  %2806 = vmatprep.mubr.bf16.mxu0 %v2478_v12 }
  0x8f   : > { %2836 = vmatprep.subr.bf16.mxu0 %v2985_v5  ;;  %2827 = vmatmul.mubr.bf16.vlgmr.msra.gmra.mxu1 %v3387_v48  ;;  %v2488_v48 = vcombine.low %v3455_v10, %v3572_v42  ;;  %v2994_v10 = vld [vmem:[%s3743_s1 + $0x1d0] sm:$0xff]  }
  0x90   : > { %2859 = vmatpush3.bf16.msra.mxu1 %v2984_v60  ;;  %2830 = vmatprep.mubr.bf16.mxu1 %v3412_v57  ;;  %v2991_v57 = vld [vmem:[%s3743_s1 + $0x220] sm:$0xff]  }
  0x91   : > { %2860 = vmatprep.subr.bf16.mxu1 %v2986_v45 }
  0x92   : > { %2837 = vmatpush3.bf16.msra.mxu0 %v2985_v5 }
  0x93   : > { %2838 = vmatprep.subr.bf16.mxu0 %v2987_v15 }
  0x94   : > { %2861 = vmatpush3.bf16.msra.mxu1 %v2986_v45 }
  0x95   : > { %2807 = vmatmul.mubr.bf16.gmra.mxu0 %v2479_v46  ;;  %2862 = vmatprep.subr.bf16.mxu1 %v2988_v18 }
  0x96   : > { %2839 = vmatpush3.bf16.msra.mxu0 %v2987_v15  ;;  %2850 = vmatprep.mubr.bf16.mxu0 %v3222_v4  ;;  %v1892_v4 = vshll.u32 %v3572_v42, 16 }
  0x97   : > { %2840 = vmatprep.subr.bf16.mxu0 %v2990_v56  ;;  %2831 = vmatmul.mubr.bf16.gmra.mxu1 %v2488_v48 }
  0x98   : > { %2863 = vmatpush3.bf16.msra.mxu1 %v2988_v18  ;;  %2874 = vmatprep.mubr.bf16.mxu1 %v3391_v49  ;;  %v2995_v49 = vld [vmem:[%s3743_s1 + $0x210] sm:$0xff]   ;;  %v1894_v17 = vrot.slane %v1892_v4, 5 }
  0x99   : > { %2864 = vmatprep.subr.bf16.mxu1 %v2991_v57 }
  0x9a   : > { %2841 = vmatpush3.bf16.msra.mxu0 %v2990_v56  ;;  %v1895_v29 = vor.u32 %v1894_v17, %v1891_v25 }
  0x9b   : > { %2842 = vmatprep.subr.bf16.mxu0 %v2992_v58 }
  0x9c   : > { %2865 = vmatpush3.bf16.msra.mxu1 %v2991_v57  ;;  %v1896_v31 = vrot.slane %v1895_v29, 4 }
  0x9d   : > { %2866 = vmatprep.subr.bf16.mxu1 %v2993_v63 }
  0x9e   : > { %2843 = vmatpush3.bf16.msra.mxu0 %v2992_v58  ;;  %v1901_v43 = vsel %vm3179_vm2, %v1896_v31, %v1900_v32 }
  0x9f   : > { %2844 = vmatprep.subr.bf16.mxu0 %v2994_v10  ;;  %v2497_v34 = vcombine.low %v3502_v37, %v1901_v43 }
  0xa0   : > { %2867 = vmatpush3.bf16.msra.mxu1 %v2993_v63 }
  0xa1   : > { %2868 = vmatprep.subr.bf16.mxu1 %v2995_v49 }
  0xa2   : > { %2845 = vmatpush3.bf16.msra.mxu0 %v2994_v10 }
  0xa3   : > { %2846 = vmatprep.subr.bf16.mxu0 %v2996_v22 }
  0xa4   : > { %2869 = vmatpush3.bf16.msra.mxu1 %v2995_v49 }
  0xa5   : > { %2870 = vmatprep.subr.bf16.mxu1 %v2997_v24 }
  0xa6   : > { %2847 = vmatpush3.bf16.msra.mxu0 %v2996_v22 }
  0xa7   : > { %2848 = vmatprep.subr.bf16.mxu0 %v2998_v8 }
  0xa8   : > { %2871 = vmatpush3.bf16.msra.mxu1 %v2997_v24 }
  0xa9   : > { %2872 = vmatprep.subr.bf16.mxu1 %v2999_v28 }
  0xaa   : > { %2849 = vmatpush3.bf16.msra.mxu0 %v2998_v8 }
  0xac   : > { %2873 = vmatpush3.bf16.msra.mxu1 %v2999_v28 }
  0xad   : > { %2851 = vmatmul.mubr.bf16.vlgmr.msra.gmra.mxu0 %v3306_v7 }
  0xae   : > { %2854 = vmatprep.mubr.bf16.mxu0 %v3336_v26 }
  0xaf   : > { %2875 = vmatmul.mubr.bf16.vlgmr.msra.gmra.mxu1 %v3398_v52 }
  0xb0   : > { %2878 = vmatprep.mubr.bf16.mxu1 %v3433_v3 }
  0xb5   : > { %2855 = vmatmul.mubr.bf16.gmra.mxu0 %v2497_v34 }
  0xb7   : > { %2879 = vmatmul.mubr.bf16.gmra.mxu1 %v2507_v11 }
  0xed   : > { %v3625_v7 = vpop.f32.mrf.mxu0 }
  0xee   : > { %v2684_v40 = vpop.f32.mrf.mxu1 }
  0xef   : > { %v3627_v35 = vpop.f32.mrf.mxu0 }
  0xf0   : > { %3755 = vst [vmem:[#allocation2_spill] sm:$0xff] %v3627_v35  ;;  %v1005_v52 = vpop.f32.mrf.mxu1 }
  0xf1   : > { %v3629_v26 = vpop.f32.mrf.mxu0 }
  0xf2   : > { %3756 = vst [vmem:[#allocation3_spill] sm:$0xff] %v3629_v26  ;;  %v2685_v20 = vpop.f32.mrf.mxu1 }
  0xf3   : > { %v3631_v36 = vpop.f32.mrf.mxu0 }
  0xf4   : > { %3757 = vst [vmem:[#allocation4_spill] sm:$0xff] %v3631_v36  ;;  %v1008_v62 = vpop.f32.mrf.mxu1 }
  0xf5   : > { %v3633_v3 = vpop.f32.mrf.mxu0 }
  0xf6   : > { %3758 = vst [vmem:[#allocation5_spill] sm:$0xff] %v3633_v3 }
  0xf7   : > { %v3635_v16 = vpop.f32.mrf.mxu0 }
  0xf8   : > { %3759 = vst [vmem:[#allocation6_spill] sm:$0xff] %v3635_v16 }
  0xf9   : > { %v3637_v2 = vpop.f32.mrf.mxu0 }
  0xfa   : > { %3760 = vst [vmem:[#allocation7_spill] sm:$0xff] %v3637_v2 }
  0xfb   : > { %v3639_v59 = vpop.f32.mrf.mxu0 }
  0xfc   : > { %3761 = vst [vmem:[#allocation8_spill] sm:$0xff] %v3639_v59 }
 0x100   : > { %v2688_v37 = vpop.f32.mrf.mxu1 }
 0x102   : > { %v1021_v0 = vpop.f32.mrf.mxu1 }
 0x104   : > { %v2689_v13 = vpop.f32.mrf.mxu1 }
 0x106   : > { %v3641_v50 = vpop.f32.mrf.mxu1 }
 0x10d   : > { %v2708_v14 = vpop.f32.mrf.mxu0 }
 0x10e   : > { %v1151_v29 = vadd.f32 %v2708_v14, %v2684_v40 }
 0x10f   : > { %v1142_v47 = vpop.f32.mrf.mxu0  ;;  %v2732_v6 = vpop.f32.mrf.mxu1 }
 0x110   : > { %v1143_v31 = vadd.f32 %v1142_v47, %v1005_v52  ;;  %v1347_v19 = vadd.f32 %v2732_v6, %v1151_v29  ;;  %v3767_v29 = vld [vmem:[#allocation4_spill] sm:$0xff] }
 0x111   : > { %v2709_v23 = vpop.f32.mrf.mxu0  ;;  %v1314_v39 = vpop.f32.mrf.mxu1 }
 0x112   : > { %v1154_v33 = vadd.f32 %v2709_v23, %v2685_v20  ;;  %v1345_v34 = vadd.f32 %v1314_v39, %v1143_v31 }
 0x113   : > { %v1145_v44 = vpop.f32.mrf.mxu0  ;;  %v2733_v53 = vpop.f32.mrf.mxu1 }
 0x114   : > { %v1146_v38 = vadd.f32 %v1145_v44, %v1008_v62  ;;  %v1348_v3 = vadd.f32 %v2733_v53, %v1154_v33 }
 0x115   : > { %v2712_v51 = vpop.f32.mrf.mxu0  ;;  %v1317_v55 = vpop.f32.mrf.mxu1 }
 0x116   : > { %v1167_v2 = vadd.f32 %v2712_v51, %v2688_v37 }
 0x117   : > { %v1158_v54 = vpop.f32.mrf.mxu0  ;;  %v2736_v41 = vpop.f32.mrf.mxu1 }
 0x118   : > { %v1159_v36 = vadd.f32 %v1158_v54, %v1021_v0  ;;  %v1351_v52 = vadd.f32 %v2736_v41, %v1167_v2 }
 0x119   : > { %v2713_v60 = vpop.f32.mrf.mxu0  ;;  %v1330_v61 = vpop.f32.mrf.mxu1 }
 0x11a   : > { %v1170_v47 = vadd.f32 %v2713_v60, %v2689_v13  ;;  %v1349_v62 = vadd.f32 %v1330_v61, %v1159_v36 }
 0x11b   : > { %v1161_v1 = vpop.f32.mrf.mxu0  ;;  %v2737_v12 = vpop.f32.mrf.mxu1 }
 0x11c   : > { %v1162_v44 = vadd.f32 %v1161_v1, %v3641_v50  ;;  %v1352_v2 = vadd.f32 %v2737_v12, %v1170_v47  ;;  %v3664_v12 = vld [vmem:[%s3749_s7] ss:$0 sm:$0xff] }
 0x11d   : > { %v1333_v9 = vpop.f32.mrf.mxu1 }
 0x12d   : > { %v2756_v5 = vpop.f32.mrf.mxu0 }
 0x12e   : > { %v1478_v11 = vadd.f32 %v2756_v5, %v1347_v19 }
 0x12f   : > { %v1445_v45 = vpop.f32.mrf.mxu0  ;;  %v2780_v15 = vpop.f32.mrf.mxu1 }
 0x130   : > { %v1622_v26 = vadd.f32 %v2780_v15, %v1478_v11 }
 0x131   : > { %v2757_v46 = vpop.f32.mrf.mxu0  ;;  %v1589_v42 = vpop.f32.mrf.mxu1 }
 0x132   : > { %v1479_v35 = vadd.f32 %v2757_v46, %v1348_v3  ;;  %v3657_v3 = vld [vmem:[%s3748_s6] ss:$0 sm:$0xff] }
 0x133   : > { %v1448_v18 = vpop.f32.mrf.mxu0  ;;  %v2781_v56 = vpop.f32.mrf.mxu1 }
 0x134   : > { %v1623_v37 = vadd.f32 %v2781_v56, %v1479_v35 }
 0x135   : > { %v2760_v48 = vpop.f32.mrf.mxu0  ;;  %v1592_v57 = vpop.f32.mrf.mxu1 }
 0x136   : > { %v1482_v39 = vadd.f32 %v2760_v48, %v1351_v52  ;;  %v3669_v48 = vld [vmem:[%s3746_s4] ss:$0 sm:$0xff] }
 0x137   : > { %v1461_v58 = vpop.f32.mrf.mxu0  ;;  %v2784_v63 = vpop.f32.mrf.mxu1 }
 0x138   : > { %v1480_v0 = vadd.f32 %v1461_v58, %v1349_v62  ;;  %v1626_v36 = vadd.f32 %v2784_v63, %v1482_v39  ;;  %v3764_v58 = vld [vmem:[#allocation2_spill] sm:$0xff]  ;;  %v3765_v63 = vld [vmem:[#allocation3_spill] sm:$0xff] }
 0x139   : > { %v2761_v10 = vpop.f32.mrf.mxu0  ;;  %v1605_v21 = vpop.f32.mrf.mxu1 }
 0x13a   : > { %v1483_v50 = vadd.f32 %v2761_v10, %v1352_v2  ;;  %v1624_v15 = vadd.f32 %v1605_v21, %v1480_v0  ;;  %v772_v10 = vmul.f32 %v3765_v63, %v3657_v3  ;;  %v3771_v63 = vld [vmem:[#allocation7_spill] sm:$0xff] }
 0x13b   : > { %v1464_v4 = vpop.f32.mrf.mxu0  ;;  %v3643_v49 = vpop.f32.mrf.mxu1 }
 0x13c   : > { %3762 = vst [vmem:[#allocation9_spill] sm:$0xff] %v3643_v49  ;;  %v1346_v49 = vadd.f32 %v1317_v55, %v1146_v38  ;;  %v787_v62 = vadd.f32 %v3664_v12, %v772_v10  ;;  %v776_v10 = vmul.f32 %v3771_v63, %v3657_v3 }
 0x13d   : > { %v3645_v24 = vpop.f32.mrf.mxu1 }
 0x13e   : > { %3763 = vst [vmem:[#allocation10_spill] sm:$0xff] %v3645_v24  ;;  %v1476_v24 = vadd.f32 %v1445_v45, %v1345_v34  ;;  %v1477_v23 = vadd.f32 %v1448_v18, %v1346_v49  ;;  %v771_v45 = vmul.f32 %v3625_v7, %v3657_v3  ;;  %v769_v7 = vmul.f32 %v3657_v3, %v3764_v58 }
 0x140   : > { %v1620_v20 = vadd.f32 %v1589_v42, %v1476_v24  ;;  %v1621_v13 = vadd.f32 %v1592_v57, %v1477_v23  ;;  %v784_v52 = vadd.f32 %v3664_v12, %v769_v7 }
 0x145   : > { %v3768_v33 = vld [vmem:[#allocation10_spill] sm:$0xff] }
 0x14d   : > { %v2804_v22 = vpop.f32.mrf.mxu0 }
 0x14e   : > { %v1757_v6 = vadd.f32 %v2804_v22, %v1622_v26  ;;  %v1350_v26 = vadd.f32 %v1333_v9, %v1162_v44  ;;  %v3766_v22 = vld [vmem:[#allocation9_spill] sm:$0xff] }
 0x14f   : > { %v1724_v25 = vpop.f32.mrf.mxu0  ;;  %v2828_v17 = vpop.f32.mrf.mxu1  ;;  %v1627_v24 = vadd.f32 %v3766_v22, %v1483_v50 }
 0x150   : > { %v1755_v51 = vadd.f32 %v1724_v25, %v1620_v20  ;;  %v1882_v55 = vadd.f32 %v2828_v17, %v1757_v6  ;;  %v1481_v42 = vadd.f32 %v1464_v4, %v1350_v26  ;;  %v3679_v17 = vld [vmem:[%s3747_s5] ss:$0 sm:$0xff] }
 0x151   : > { %v2805_v8 = vpop.f32.mrf.mxu0  ;;  %v1849_v27 = vpop.f32.mrf.mxu1 }
 0x152   : > { %v1758_v41 = vadd.f32 %v2805_v8, %v1623_v37  ;;  %v1880_v61 = vadd.f32 %v1849_v27, %v1755_v51 }
 0x153   : > { %v1727_v28 = vpop.f32.mrf.mxu0  ;;  %v2829_v30 = vpop.f32.mrf.mxu1 }
 0x154   : > { %v1756_v35 = vadd.f32 %v1727_v28, %v1621_v13  ;;  %v1883_v18 = vadd.f32 %v2829_v30, %v1758_v41  ;;  %v786_v28 = vadd.f32 %v3664_v12, %v771_v45  ;;  %v770_v30 = vmul.f32 %v3657_v3, %v3767_v29  ;;  %v3769_v41 = vld [vmem:[#allocation5_spill] sm:$0xff]  ;;  %v3770_v45 = vld [vmem:[#allocation6_spill] sm:$0xff] }
 0x155   : > { %v2808_v32 = vpop.f32.mrf.mxu0  ;;  %v1852_v43 = vpop.f32.mrf.mxu1  ;;  %v775_v26 = vmul.f32 %v3769_v41, %v3657_v3 }
 0x156   : > { %v1761_v9 = vadd.f32 %v2808_v32, %v1626_v36  ;;  %v1881_v4 = vadd.f32 %v1852_v43, %v1756_v35  ;;  %v1625_v43 = vadd.f32 %v3768_v33, %v1481_v42 }
 0x157   : > { %v3647_v59 = vpop.f32.mrf.mxu1  ;;  %v1740_v16 = vpop.f32.mrf.mxu0 }
 0x158   : > { %v1759_v25 = vadd.f32 %v1740_v16, %v1624_v15  ;;  %v1886_v16 = vadd.f32 %v3647_v59, %v1761_v9  ;;  %v773_v15 = vmul.f32 %v3657_v3, %v3770_v45 }
 0x159   : > { %v3649_v40 = vpop.f32.mrf.mxu1  ;;  %v2809_v14 = vpop.f32.mrf.mxu0 }
 0x15a   : > { %v1762_v34 = vadd.f32 %v2809_v14, %v1627_v24  ;;  %v1884_v44 = vadd.f32 %v3649_v40, %v1759_v25 }
 0x15b   : > { %v3652_v53 = vpop.f32.mrf.mxu1  ;;  %v1743_v54 = vpop.f32.mrf.mxu0 }
 0x15c   : > { %v1760_v39 = vadd.f32 %v1743_v54, %v1625_v43  ;;  %v1887_v36 = vadd.f32 %v3652_v53, %v1762_v34  ;;  %v791_v34 = vadd.f32 %v3664_v12, %v776_v10 }
 0x15d   : > { %v1868_v1 = vpop.f32.mrf.mxu1 }
 0x15e   : > { %v1885_v53 = vadd.f32 %v1868_v1, %v1760_v39 }
 0x16d   : > { %v2852_v60 = vpop.f32.mrf.mxu0 }
 0x16e   : > { %v2020_v5 = vadd.f32 %v2852_v60, %v1882_v55  ;;  %v785_v55 = vadd.f32 %v3664_v12, %v770_v30 }
 0x16f   : > { %v1987_v46 = vpop.f32.mrf.mxu0  ;;  %v2876_v56 = vpop.f32.mrf.mxu1 }
 0x170   : > { %v2018_v57 = vadd.f32 %v1987_v46, %v1880_v61  ;;  %v2149_v21 = vadd.f32 %v2876_v56, %v2020_v5 }
 0x171   : > { %v2853_v49 = vpop.f32.mrf.mxu0  ;;  %v2116_v8 = vpop.f32.mrf.mxu1 }
 0x172   : > { %v2021_v27 = vadd.f32 %v2853_v49, %v1883_v18  ;;  %v2164_v31 = vmul.f32 %v3669_v48, %v2149_v21  ;;  %v2147_v32 = vadd.f32 %v2116_v8, %v2018_v57  ;;  %v790_v8 = vadd.f32 %v3664_v12, %v775_v26 }
 0x173   : > { %v1990_v19 = vpop.f32.mrf.mxu0  ;;  %v2877_v38 = vpop.f32.mrf.mxu1 }
 0x174   : > { %v2019_v11 = vadd.f32 %v1990_v19, %v1881_v4  ;;  %v2179_v47 = vadd.f32 %v3679_v17, %v2164_v31  ;;  %v2162_v20 = vmul.f32 %v3669_v48, %v2147_v32  ;;  %v2150_v23 = vadd.f32 %v2877_v38, %v2021_v27 }
 0x175   : > { %v2856_v6 = vpop.f32.mrf.mxu0  ;;  %v2119_v37 = vpop.f32.mrf.mxu1  ;;  %v788_v27 = vadd.f32 %v3664_v12, %v773_v15 }
 0x176   : > { %v2024_v51 = vadd.f32 %v2856_v6, %v1886_v16  ;;  %v2187_v59 = vadd.f32 %v2179_v47, %v786_v28  ;;  %v2177_v14 = vadd.f32 %v3679_v17, %v2162_v20  ;;  %v2165_v0 = vmul.f32 %v3669_v48, %v2150_v23  ;;  %v3772_v28 = vld [vmem:[#allocation8_spill] sm:$0xff] }
 0x177   : > { %v2148_v2 = vadd.f32 %v2119_v37, %v2019_v11  ;;  %v2003_v13 = vpop.f32.mrf.mxu0  ;;  %v2880_v40 = vpop.f32.mrf.mxu1  ;;  %v774_v29 = vmul.f32 %v3657_v3, %v3772_v28 }
 0x178   : > { %v2022_v54 = vadd.f32 %v2003_v13, %v1884_v44  ;;  %v2195_v60 = vmax.f32 %v2187_v59, 0.0  ;;  %v2185_v50 = vadd.f32 %v2177_v14, %v784_v52  ;;  %v2180_v61 = vadd.f32 %v3679_v17, %v2165_v0 }
 0x179   : > { %v2163_v35 = vmul.f32 %v3669_v48, %v2148_v2  ;;  %v2857_v5 = vpop.f32.mrf.mxu0  ;;  %v2153_v46 = vadd.f32 %v2880_v40, %v2024_v51  ;;  %v2132_v42 = vpop.f32.mrf.mxu1  ;;  %v789_v47 = vadd.f32 %v3664_v12, %v774_v29 }
 0x17a   : > { %v2025_v18 = vadd.f32 %v2857_v5, %v1887_v36  ;;  %2203 = vst [vmem:[%s3702_s14 + $0x10] sm:$0xff] %v2195_v60  ;;  %v2193_v9 = vmax.f32 %v2185_v50, 0.0  ;;  %v2188_v56 = vadd.f32 %v2180_v61, %v787_v62  ;;  %v2151_v58 = vadd.f32 %v2132_v42, %v2022_v54 }
 0x17b   : > { %v2178_v57 = vadd.f32 %v3679_v17, %v2163_v35  ;;  %v2006_v7 = vpop.f32.mrf.mxu0  ;;  %v2168_v21 = vmul.f32 %v3669_v48, %v2153_v46  ;;  %v2881_v49 = vpop.f32.mrf.mxu1 }
 0x17c   : > { %v2023_v22 = vadd.f32 %v2006_v7, %v1885_v53  ;;  %2201 = vst [vmem:[%s3702_s14] sm:$0xff] %v2193_v9  ;;  %v2196_v1 = vmax.f32 %v2188_v56, 0.0  ;;  %v2166_v4 = vmul.f32 %v3669_v48, %v2151_v58  ;;  %v2154_v25 = vadd.f32 %v2881_v49, %v2025_v18 }
 0x17d   : > { %v2186_v24 = vadd.f32 %v2178_v57, %v785_v55  ;;  %v2183_v30 = vadd.f32 %v3679_v17, %v2168_v21  ;;  %v2135_v31 = vpop.f32.mrf.mxu1 }
 0x17e   : > { %2204 = vst [vmem:[%s3702_s14 + $0x18] sm:$0xff] %v2196_v1  ;;  %v2181_v19 = vadd.f32 %v3679_v17, %v2166_v4  ;;  %v2169_v33 = vmul.f32 %v3669_v48, %v2154_v25  ;;  %v2152_v43 = vadd.f32 %v2135_v31, %v2023_v22 }
 0x17f   : > { %v2194_v32 = vmax.f32 %v2186_v24, 0.0  ;;  %v2191_v16 = vadd.f32 %v2183_v30, %v790_v8 }
 0x180   : > { %v2189_v38 = vadd.f32 %v2181_v19, %v788_v27  ;;  %v2184_v3 = vadd.f32 %v3679_v17, %v2169_v33  ;;  %v2167_v11 = vmul.f32 %v3669_v48, %v2152_v43 }
 0x181   : > { %2202 = vst [vmem:[%s3702_s14 + $0x8] sm:$0xff] %v2194_v32  ;;  %v2199_v52 = vmax.f32 %v2191_v16, 0.0 }
 0x182   : > { %v2197_v20 = vmax.f32 %v2189_v38, 0.0  ;;  %v2192_v23 = vadd.f32 %v2184_v3, %v791_v34  ;;  %v2182_v6 = vadd.f32 %v3679_v17, %v2167_v11 }
 0x183   : > { %2207 = vst [vmem:[%s3702_s14 + $0x30] sm:$0xff] %v2199_v52 }
 0x184   : > { %2205 = vst [vmem:[%s3702_s14 + $0x20] sm:$0xff] %v2197_v20  ;;  %v2200_v62 = vmax.f32 %v2192_v23, 0.0  ;;  %v2190_v44 = vadd.f32 %v2182_v6, %v789_v47 }
 0x186   : > { %2208 = vst [vmem:[%s3702_s14 + $0x38] sm:$0xff] %v2200_v62  ;;  %v2198_v39 = vmax.f32 %v2190_v44, 0.0 }
 0x188   : > { %2206 = vst [vmem:[%s3702_s14 + $0x28] sm:$0xff] %v2198_v39 }
 0x189 PF: > { %s18_s29 = sadd.s32 1, %s3022_s29   ;;  %s3773_s27 = smov %s3018_s28 }
 0x18a   : > { %p15_p5 = scmp.ge.s32.totalorder %s18_s29, 4   ;;  %s3774_s28 = smov %s3776_s30 }
 0x18c   :  { %17 = sbr.rel (!%p15_p5) target bundleno = 2 (0x2), region = 103 }

</bundles_post_ra>
